<compile_context>
chip_gen: v7x
topology: tpu7x:2x2x1
jax: 0.10.0
libtpu: 0.0.40
codegen_flags: <defaults>
</compile_context>

<pallas_src>
import jax
import jax.numpy as jnp
from jax.experimental import pallas as pl
from jax.experimental.pallas import tpu as pltpu


def _sigmoid(x):
    # Exact sigmoid via tanh: EUP slot, avoids an f32 divide on the VPU
    # inside the serial recurrence.
    return 0.5 * jnp.tanh(0.5 * x) + 0.5


def _zeros_index_map(ndim):
    return lambda *_: (0,) * ndim


# ----------------------------------------------------------------------------
# Fused kernel: CNN (composed matmuls, Conv2d pre-fused) + fc_in + LSTM + fc_final.
# ----------------------------------------------------------------------------
def make_fused_kernel(b_pad, seq, hid, n_conv, rnn_layer, compute_dtype):
    def kernel(*refs):
        pos = 0
        xg_ref = refs[pos]; pos += 1                        # (S*B_pad, G*H)  rows (s, b)
        conv_refs = refs[pos:pos + 2 * n_conv]; pos += 2 * n_conv
        fcw_ref = refs[pos]; pos += 1                       # (C_last, hid)
        fcb_ref = refs[pos]; pos += 1                       # (1, hid)
        lstm_refs = refs[pos:pos + 3 * rnn_layer]; pos += 3 * rnn_layer
        fcfw_ref = refs[pos]; pos += 1                      # (hid, 1)
        fcfb_ref = refs[pos]; pos += 1                      # (1, 1)
        fc_hid_ref = refs[pos]; pos += 1                    # out: (S*B_pad, hid)
        pred_ref = refs[pos]; pos += 1                      # out: (B_pad, 1)
        xs_scratch = refs[pos]; pos += 1                    # VMEM (S*B_pad, hid)

        def mm(a, w_ref):
            # Weights are pre-cast to compute_dtype host-side; activations are
            # cast here. Accumulation stays f32.
            return jnp.dot(a.astype(compute_dtype), w_ref[...],
                           preferred_element_type=jnp.float32)

        # ---- CNN stack: one matmul per layer (Conv2d fused into layer 0) ----
        z = xg_ref[...]
        for i in range(n_conv):
            z = jnp.tanh(mm(z, conv_refs[2 * i]) + conv_refs[2 * i + 1][...])
        # z: (S*B_pad, C_last) == day_reps flattened in (s, b) row order.

        # ---- fc_in + Tanh over the whole sequence in one matmul ----
        fc = jnp.tanh(mm(z, fcw_ref) + fcb_ref[...])
        fc_hid_ref[...] = fc                                # (S*B_pad, hid)
        # TODO(synk): present fc_hid as a lane-dense ((S*B_pad*hid)//128, 128)
        # slab if hid or S*B is ever scaled (masked vst is negligible here).

        # ---- multi-layer LSTM (gate order i, f, g, o; zero initial state) ----
        xs = fc
        for l in range(rnn_layer):
            whh = lstm_refs[3 * l + 1][...]                 # (hid, 4H) compute_dtype
            bb = lstm_refs[3 * l + 2][...]                  # (1, 4H) == b_ih + b_hh

            # Input projection hoisted out of the recurrence: one matmul.
            gx = mm(xs, lstm_refs[3 * l]) + bb              # (S*B_pad, 4H) f32

            h = jnp.zeros((b_pad, hid), jnp.float32)
            c = jnp.zeros((b_pad, hid), jnp.float32)
            last = (l == rnn_layer - 1)
            # TODO(synk): convert to lax.fori_loop carrying (h, c) with pl.ds
            # row indexing when seq grows past a handful of steps (vreg pressure).
            for t in range(seq):
                r = t * b_pad                               # 8-sublane-aligned block
                # ONE fused gate matmul per step: (B_pad,hid)@(hid,4H) -> 128 lanes.
                gates = gx[r:r + b_pad, :] + jnp.dot(
                    h.astype(compute_dtype), whh,
                    preferred_element_type=jnp.float32)
                i_g = _sigmoid(gates[:, 0 * hid:1 * hid])
                f_g = _sigmoid(gates[:, 1 * hid:2 * hid])
                g_g = jnp.tanh(gates[:, 2 * hid:3 * hid])
                o_g = _sigmoid(gates[:, 3 * hid:4 * hid])
                c = f_g * c + i_g * g_g
                h = o_g * jnp.tanh(c)
                if not last:
                    xs_scratch[r:r + b_pad, :] = h          # aligned VMEM write
            if not last:
                xs = xs_scratch[...]                        # next layer's (S*B_pad, hid)

        # ---- fc_final on the last time step of the last layer ----
        pred_ref[...] = mm(h, fcfw_ref) + fcfb_ref[...]

    return kernel


# ----------------------------------------------------------------------------
# One-time host-side weight composition (cached; NOT re-run per forward call).
# ----------------------------------------------------------------------------
def prepare_params(params, cfg, compute_dtype=jnp.float32):
    H = cfg['input_size']
    W = cfg['input_length']
    D = cfg['input_day']
    hid = cfg['hid_size']
    out_chnls = cfg['out_chnls']
    kernels = cfg['kernel']
    strides = cfg['stride']
    rnn_layer = cfg['rnn_layer']
    n_conv = len(kernels)
    f32 = jnp.float32

    # Conv chain output length.
    L = W
    for k, s in zip(kernels, strides):
        if k != s:
            # TODO(synk): kernel != stride (overlapping Conv1d windows) needs an
            # XLA-side im2col path; module defaults use kernel == stride.
            raise NotImplementedError("composed-conv fast path requires kernel == stride")
        L = (L - k) // s + 1
    G = 1
    for k in kernels:
        G *= k                        # raw W positions per final output position
    S = D * L

    C0 = out_chnls[0]
    w2d_big = jnp.kron(jnp.eye(G, dtype=f32), params['w2d'])     # (G*H, G*C0)
    b2d_big = jnp.tile(params['b2d'], (1, G))                    # (1, G*C0)

    conv_inputs = []
    m = G
    c_in = C0
    for i, k in enumerate(kernels):
        m = m // k                                   # windows of layer i per final window
        w = params['conv1d_w'][i]                    # (k, c_in, c_out)
        c_out = w.shape[2]
        wf = w.reshape(k * c_in, c_out)
        w_big = jnp.kron(jnp.eye(m, dtype=f32), wf)              # (m*k*c_in, m*c_out)
        b_big = jnp.tile(params['conv1d_b'][i], (1, m))          # (1, m*c_out)
        if i == 0:
            # Algebraic Conv2d + first Conv1d fusion (no activation in between):
            #   x @ W2d + b2d  then  @ Wc0 + bc0   ==   x @ (W2d@Wc0) + (b2d@Wc0 + bc0)
            b_big = b2d_big @ w_big + b_big
            w_big = w2d_big @ w_big
        conv_inputs.append(w_big.astype(compute_dtype))
        conv_inputs.append(b_big)                    # biases kept in f32
        c_in = c_out

    # LSTM weights: pre-summed biases; gate splits happen in-kernel.
    lstm_inputs = []
    for l in range(rnn_layer):
        p = params['lstm'][l]
        lstm_inputs += [p['w_ih'].astype(compute_dtype),
                        p['w_hh'].astype(compute_dtype),
                        p['b_ih'] + p['b_hh']]

    weights = (conv_inputs
               + [params['fc_w'].astype(compute_dtype), params['fc_b']]
               + lstm_inputs
               + [params['fcf_w'].astype(compute_dtype), params['fcf_b']])

    # Force materialization once (so later forward calls never re-run the kron/tile).
    weights = [jax.block_until_ready(jnp.asarray(a)) for a in weights]

    return dict(weights=weights, n_conv=n_conv, rnn_layer=rnn_layer,
                L=L, G=G, S=S, hid=hid, compute_dtype=compute_dtype)


# ----------------------------------------------------------------------------
# Wrapper: cheap input layout transform + single fused pallas_call.
# ----------------------------------------------------------------------------
def mix_model_forward(x, prepared, cfg):
    B, D, H, W = x.shape
    hid = prepared['hid']
    L, G, S = prepared['L'], prepared['G'], prepared['S']
    n_conv = prepared['n_conv']
    rnn_layer = prepared['rnn_layer']
    W_used = L * G                    # trailing remainder columns dropped (as in torch)
    B_pad = max(8, -(-B // 8) * 8)    # sublane-aligned batch (multiple of 8)

    # (B, D, H, W) -> rows ordered (s, b_pad), features (g, h); zero-pad batch rows.
    xt = jnp.transpose(x, (0, 1, 3, 2)).astype(jnp.float32)[:, :, :W_used, :]  # (B,D,Wu,H)
    xg = xt.reshape(B, D, L, G * H)
    xg = jnp.transpose(xg, (1, 2, 0, 3))                          # (D, L, B, G*H)
    xg = jnp.pad(xg, ((0, 0), (0, 0), (0, B_pad - B), (0, 0)))
    xg = xg.reshape(S * B_pad, G * H)

    inputs = [xg] + prepared['weights']
    in_specs = [pl.BlockSpec(a.shape, _zeros_index_map(a.ndim)) for a in inputs]

    # TODO(synk): at larger B/S, add a 'parallel' batch grid axis (v7x 2-TC) and
    # tile S via BlockSpec instead of the current single all-resident block.
    fc_hid_flat, pred = pl.pallas_call(
        make_fused_kernel(B_pad, S, hid, n_conv, rnn_layer, prepared['compute_dtype']),
        grid=(1,),
        in_specs=in_specs,
        out_specs=[pl.BlockSpec((S * B_pad, hid), lambda i: (0, 0)),
                   pl.BlockSpec((B_pad, 1), lambda i: (0, 0))],
        out_shape=(jax.ShapeDtypeStruct((S * B_pad, hid), jnp.float32),
                   jax.ShapeDtypeStruct((B_pad, 1), jnp.float32)),
        scratch_shapes=[pltpu.VMEM((S * B_pad, hid), jnp.float32)],
        compiler_params=pltpu.CompilerParams(dimension_semantics=("arbitrary",)),
    )(*inputs)

    # (S*B_pad, hid) rows ordered (s, b) -> (B, S, hid), dropping padded batch rows.
    fc_hid = jnp.transpose(fc_hid_flat.reshape(S, B_pad, hid)[:, :B, :], (1, 0, 2))
    return fc_hid, pred[:B, 0]


# ----------------------------------------------------------------------------
# Deterministic parameter init (kernel-ready layouts; PyTorch-style fan-in scale)
# ----------------------------------------------------------------------------
def init_params(key, cfg):
    H = cfg['input_size']
    hid = cfg['hid_size']
    out_chnls = cfg['out_chnls']
    kernels = cfg['kernel']
    rnn_layer = cfg['rnn_layer']

    keys = iter(jax.random.split(key, 64))

    def u(shape, scale):
        return jax.random.uniform(next(keys), shape, jnp.float32, -scale, scale)

    params = {}
    C0 = out_chnls[0]
    s = 1.0 / (1 * H * 1) ** 0.5
    params['w2d'] = u((H, C0), s)      # torch Conv2d weight (C0,1,H,1) -> (H, C0)
    params['b2d'] = u((1, C0), s)

    params['conv1d_w'] = []
    params['conv1d_b'] = []
    c_in = C0
    for i, c_out in enumerate(out_chnls[1:]):
        k = kernels[i]
        s = 1.0 / (c_in * k) ** 0.5
        params['conv1d_w'].append(u((k, c_in, c_out), s))   # torch (C_out,C_in,K) -> (K,C_in,C_out)
        params['conv1d_b'].append(u((1, c_out), s))
        c_in = c_out

    s = 1.0 / c_in ** 0.5
    params['fc_w'] = u((c_in, hid), s)  # torch Linear weight (hid, C) -> (C, hid)
    params['fc_b'] = u((1, hid), s)

    params['lstm'] = []
    s = 1.0 / hid ** 0.5
    for _ in range(rnn_layer):
        params['lstm'].append({
            'w_ih': u((hid, 4 * hid), s),   # torch (4H, in) -> (in, 4H); gate order i,f,g,o
            'w_hh': u((hid, 4 * hid), s),
            'b_ih': u((1, 4 * hid), s),
            'b_hh': u((1, 4 * hid), s),
        })

    s = 1.0 / hid ** 0.5
    params['fcf_w'] = u((hid, 1), s)
    params['fcf_b'] = u((1, 1), s)
    return params


# ----------------------------------------------------------------------------
# Pure-JAX reference (literal per-day / per-window math) for validation.
# ----------------------------------------------------------------------------
def reference_forward(x, params, cfg):
    B, D, H, W = x.shape
    hid = cfg['hid_size']
    kernels, strides = cfg['kernel'], cfg['stride']
    rnn_layer = cfg['rnn_layer']

    def sig(v):
        return 1.0 / (1.0 + jnp.exp(-v))

    day_list = []
    for d in range(D):
        xd = x[:, d].astype(jnp.float32)                         # (B, H, W)
        z = jnp.einsum('bhw,hc->bwc', xd, params['w2d']) + params['b2d']
        for i, (k, s) in enumerate(zip(kernels, strides)):
            w = params['conv1d_w'][i]
            b = params['conv1d_b'][i]
            l_out = (z.shape[1] - k) // s + 1
            outs = []
            for t in range(l_out):
                win = z[:, t * s:t * s + k, :]                   # (B, k, C_in)
                outs.append(jnp.tanh(jnp.einsum('bkc,kcd->bd', win, w) + b))
            z = jnp.stack(outs, axis=1)
        day_list.append(z)
    day_reps = jnp.concatenate(day_list, axis=1)                 # (B, S, C)

    fc_hid = jnp.tanh(day_reps @ params['fc_w'] + params['fc_b'][None])
    xs = fc_hid
    for l in range(rnn_layer):
        p = params['lstm'][l]
        h = jnp.zeros((B, hid), jnp.float32)
        c = jnp.zeros((B, hid), jnp.float32)
        outs = []
        for t in range(xs.shape[1]):
            g = xs[:, t] @ p['w_ih'] + p['b_ih'] + h @ p['w_hh'] + p['b_hh']
            i_g = sig(g[:, :hid])
            f_g = sig(g[:, hid:2 * hid])
            g_g = jnp.tanh(g[:, 2 * hid:3 * hid])
            o_g = sig(g[:, 3 * hid:])
            c = f_g * c + i_g * g_g
            h = o_g * jnp.tanh(c)
            outs.append(h)
        xs = jnp.stack(outs, axis=1)
    pred = xs[:, -1] @ params['fcf_w'] + params['fcf_b']
    return fc_hid, pred[:, 0]


if __name__ == "__main__":
    # input_shape = (input_size, input_length, input_day); the module requires
    # out_chnls[-1] == input_size for fc_in (true for the defaults [6,6,6]).
    cfg = dict(input_size=6, input_length=32, input_day=3,
               hid_size=32, rnn_layer=2,
               out_chnls=[6, 6, 6], kernel=[4, 4], stride=[4, 4])
    assert cfg['out_chnls'][-1] == cfg['input_size']
    B = 2

    key = jax.random.PRNGKey(0)
    kx, kp = jax.random.split(key)
    x = jax.random.normal(
        kx, (B, cfg['input_day'], cfg['input_size'], cfg['input_length']),
        dtype=jnp.float32)
    params = init_params(kp, cfg)

    # One-time composed-weight build (cached across forward calls).
    # For v6e/v7x throughput at larger sizes, pass compute_dtype=jnp.bfloat16
    # (MXU operands only; accumulation and gate math stay f32).
    prepared = prepare_params(params, cfg, compute_dtype=jnp.float32)

    fc_hid, pred = mix_model_forward(x, prepared, cfg)
    fc_hid = jax.block_until_ready(fc_hid)
    pred = jax.block_until_ready(pred)

    ref_hid, ref_pred = reference_forward(x, params, cfg)
    assert fc_hid.shape == ref_hid.shape, (fc_hid.shape, ref_hid.shape)
    assert pred.shape == ref_pred.shape, (pred.shape, ref_pred.shape)
    assert jnp.allclose(fc_hid, ref_hid, atol=2e-3, rtol=2e-3)
    assert jnp.allclose(pred, ref_pred, atol=2e-3, rtol=2e-3)

    # TODO(synk): training utilities (fit/predict/optimizer/loss/save/load) are
    # host-side and out of scope for the forward kernel.
    print("KERNEL_OK")
</pallas_src>

<mosaic_0001>
module attributes {stable_mosaic.version = 11 : i64} {
  func.func @kernel(%arg0: i32, %arg1: memref<48x96xf32, #tpu.memory_space<vmem>>, %arg2: memref<96x24xf32, #tpu.memory_space<vmem>>, %arg3: memref<1x24xf32, #tpu.memory_space<vmem>>, %arg4: memref<24x6xf32, #tpu.memory_space<vmem>>, %arg5: memref<1x6xf32, #tpu.memory_space<vmem>>, %arg6: memref<6x32xf32, #tpu.memory_space<vmem>>, %arg7: memref<1x32xf32, #tpu.memory_space<vmem>>, %arg8: memref<32x128xf32, #tpu.memory_space<vmem>>, %arg9: memref<32x128xf32, #tpu.memory_space<vmem>>, %arg10: memref<1x128xf32, #tpu.memory_space<vmem>>, %arg11: memref<32x128xf32, #tpu.memory_space<vmem>>, %arg12: memref<32x128xf32, #tpu.memory_space<vmem>>, %arg13: memref<1x128xf32, #tpu.memory_space<vmem>>, %arg14: memref<32x1xf32, #tpu.memory_space<vmem>>, %arg15: memref<1x1xf32, #tpu.memory_space<vmem>>, %arg16: memref<48x32xf32, #tpu.memory_space<vmem>>, %arg17: memref<8x1xf32, #tpu.memory_space<vmem>>, %arg18: memref<48x32xf32, #tpu.memory_space<vmem>>) attributes {dimension_semantics = [#tpu.dimension_semantics<arbitrary>], iteration_bounds = array<i64: 1>, scalar_prefetch = 0 : i64, scratch_operands = 1 : i64, tpu.core_type = #tpu.core_type<tc>, window_params = [{pipeline_mode = #tpu.pipeline_mode<synchronous>, transform_indices = @transform_0, window_bounds = array<i64: 48, 96>}, {pipeline_mode = #tpu.pipeline_mode<synchronous>, transform_indices = @transform_1, window_bounds = array<i64: 96, 24>}, {pipeline_mode = #tpu.pipeline_mode<synchronous>, transform_indices = @transform_2, window_bounds = array<i64: 1, 24>}, {pipeline_mode = #tpu.pipeline_mode<synchronous>, transform_indices = @transform_3, window_bounds = array<i64: 24, 6>}, {pipeline_mode = #tpu.pipeline_mode<synchronous>, transform_indices = @transform_4, window_bounds = array<i64: 1, 6>}, {pipeline_mode = #tpu.pipeline_mode<synchronous>, transform_indices = @transform_5, window_bounds = array<i64: 6, 32>}, {pipeline_mode = #tpu.pipeline_mode<synchronous>, transform_indices = @transform_6, window_bounds = array<i64: 1, 32>}, {pipeline_mode = #tpu.pipeline_mode<synchronous>, transform_indices = @transform_7, window_bounds = array<i64: 32, 128>}, {pipeline_mode = #tpu.pipeline_mode<synchronous>, transform_indices = @transform_8, window_bounds = array<i64: 32, 128>}, {pipeline_mode = #tpu.pipeline_mode<synchronous>, transform_indices = @transform_9, window_bounds = array<i64: 1, 128>}, {pipeline_mode = #tpu.pipeline_mode<synchronous>, transform_indices = @transform_10, window_bounds = array<i64: 32, 128>}, {pipeline_mode = #tpu.pipeline_mode<synchronous>, transform_indices = @transform_11, window_bounds = array<i64: 32, 128>}, {pipeline_mode = #tpu.pipeline_mode<synchronous>, transform_indices = @transform_12, window_bounds = array<i64: 1, 128>}, {pipeline_mode = #tpu.pipeline_mode<synchronous>, transform_indices = @transform_13, window_bounds = array<i64: 32, 1>}, {pipeline_mode = #tpu.pipeline_mode<synchronous>, transform_indices = @transform_14, window_bounds = array<i64: 1, 1>}, {pipeline_mode = #tpu.pipeline_mode<synchronous>, transform_indices = @transform_15, window_bounds = array<i64: 48, 32>}, {pipeline_mode = #tpu.pipeline_mode<synchronous>, transform_indices = @transform_16, window_bounds = array<i64: 8, 1>}]} {
    %c0 = arith.constant 0 : index
    %c0_0 = arith.constant 0 : index
    %0 = vector.load %arg1[%c0, %c0_0] : memref<48x96xf32, #tpu.memory_space<vmem>>, vector<48x96xf32>
    %c0_1 = arith.constant 0 : index
    %c0_2 = arith.constant 0 : index
    %1 = vector.load %arg2[%c0_1, %c0_2] : memref<96x24xf32, #tpu.memory_space<vmem>>, vector<96x24xf32>
    %cst = arith.constant dense<0.000000e+00> : vector<48x24xf32>
    %2 = tpu.matmul %0, %1, %cst {dimension_numbers = #tpu.dot_dimension_numbers<[1], [0], [0], [1], [0, 0, 1, 1], [], []>} : vector<48x96xf32>, vector<96x24xf32>, vector<48x24xf32> -> vector<48x24xf32>
    %c0_3 = arith.constant 0 : index
    %c0_4 = arith.constant 0 : index
    %3 = vector.load %arg3[%c0_3, %c0_4] : memref<1x24xf32, #tpu.memory_space<vmem>>, vector<1x24xf32>
    %4 = vector.broadcast %3 : vector<1x24xf32> to vector<48x24xf32>
    %5 = arith.addf %2, %4 : vector<48x24xf32>
    %6 = math.tanh %5 : vector<48x24xf32>
    %c0_5 = arith.constant 0 : index
    %c0_6 = arith.constant 0 : index
    %7 = vector.load %arg4[%c0_5, %c0_6] : memref<24x6xf32, #tpu.memory_space<vmem>>, vector<24x6xf32>
    %cst_7 = arith.constant dense<0.000000e+00> : vector<48x6xf32>
    %8 = tpu.matmul %6, %7, %cst_7 {dimension_numbers = #tpu.dot_dimension_numbers<[1], [0], [0], [1], [0, 0, 1, 1], [], []>} : vector<48x24xf32>, vector<24x6xf32>, vector<48x6xf32> -> vector<48x6xf32>
    %c0_8 = arith.constant 0 : index
    %c0_9 = arith.constant 0 : index
    %9 = vector.load %arg5[%c0_8, %c0_9] : memref<1x6xf32, #tpu.memory_space<vmem>>, vector<1x6xf32>
    %10 = vector.broadcast %9 : vector<1x6xf32> to vector<48x6xf32>
    %11 = arith.addf %8, %10 : vector<48x6xf32>
    %12 = math.tanh %11 : vector<48x6xf32>
    %c0_10 = arith.constant 0 : index
    %c0_11 = arith.constant 0 : index
    %13 = vector.load %arg6[%c0_10, %c0_11] : memref<6x32xf32, #tpu.memory_space<vmem>>, vector<6x32xf32>
    %cst_12 = arith.constant dense<0.000000e+00> : vector<48x32xf32>
    %14 = tpu.matmul %12, %13, %cst_12 {dimension_numbers = #tpu.dot_dimension_numbers<[1], [0], [0], [1], [0, 0, 1, 1], [], []>} : vector<48x6xf32>, vector<6x32xf32>, vector<48x32xf32> -> vector<48x32xf32>
    %c0_13 = arith.constant 0 : index
    %c0_14 = arith.constant 0 : index
    %15 = vector.load %arg7[%c0_13, %c0_14] : memref<1x32xf32, #tpu.memory_space<vmem>>, vector<1x32xf32>
    %16 = vector.broadcast %15 : vector<1x32xf32> to vector<48x32xf32>
    %17 = arith.addf %14, %16 : vector<48x32xf32>
    %18 = math.tanh %17 : vector<48x32xf32>
    %c0_15 = arith.constant 0 : index
    %c0_16 = arith.constant 0 : index
    %19 = vector.load %arg16[%c0_15, %c0_16] : memref<48x32xf32, #tpu.memory_space<vmem>>, vector<48x32xf32>
    tpu.vector_store %arg16[%c0_15, %c0_16], %18 {strides = array<i32>} : memref<48x32xf32, #tpu.memory_space<vmem>>, vector<48x32xf32>,
    %c0_17 = arith.constant 0 : index
    %c0_18 = arith.constant 0 : index
    %20 = vector.load %arg9[%c0_17, %c0_18] : memref<32x128xf32, #tpu.memory_space<vmem>>, vector<32x128xf32>
    %c0_19 = arith.constant 0 : index
    %c0_20 = arith.constant 0 : index
    %21 = vector.load %arg10[%c0_19, %c0_20] : memref<1x128xf32, #tpu.memory_space<vmem>>, vector<1x128xf32>
    %c0_21 = arith.constant 0 : index
    %c0_22 = arith.constant 0 : index
    %22 = vector.load %arg8[%c0_21, %c0_22] : memref<32x128xf32, #tpu.memory_space<vmem>>, vector<32x128xf32>
    %cst_23 = arith.constant dense<0.000000e+00> : vector<48x128xf32>
    %23 = tpu.matmul %18, %22, %cst_23 {dimension_numbers = #tpu.dot_dimension_numbers<[1], [0], [0], [1], [0, 0, 1, 1], [], []>} : vector<48x32xf32>, vector<32x128xf32>, vector<48x128xf32> -> vector<48x128xf32>
    %24 = vector.broadcast %21 : vector<1x128xf32> to vector<48x128xf32>
    %25 = arith.addf %23, %24 : vector<48x128xf32>
    %cst_24 = arith.constant 0.000000e+00 : f32
    %26 = vector.broadcast %cst_24 : f32 to vector<8x32xf32>
    %cst_25 = arith.constant 0.000000e+00 : f32
    %27 = vector.broadcast %cst_25 : f32 to vector<8x32xf32>
    %28 = vector.extract_strided_slice %25 {offsets = [0, 0], sizes = [8, 128], strides = [1, 1]} : vector<48x128xf32> to vector<8x128xf32>
    %cst_26 = arith.constant dense<0.000000e+00> : vector<8x128xf32>
    %29 = tpu.matmul %26, %20, %cst_26 {dimension_numbers = #tpu.dot_dimension_numbers<[1], [0], [0], [1], [0, 0, 1, 1], [], []>} : vector<8x32xf32>, vector<32x128xf32>, vector<8x128xf32> -> vector<8x128xf32>
    %30 = arith.addf %28, %29 : vector<8x128xf32>
    %31 = vector.extract_strided_slice %30 {offsets = [0, 0], sizes = [8, 32], strides = [1, 1]} : vector<8x128xf32> to vector<8x32xf32>
    %cst_27 = arith.constant 5.000000e-01 : f32
    %32 = vector.broadcast %cst_27 : f32 to vector<8x32xf32>
    %33 = arith.mulf %32, %31 : vector<8x32xf32>
    %34 = math.tanh %33 : vector<8x32xf32>
    %cst_28 = arith.constant 5.000000e-01 : f32
    %35 = vector.broadcast %cst_28 : f32 to vector<8x32xf32>
    %36 = arith.mulf %35, %34 : vector<8x32xf32>
    %cst_29 = arith.constant 5.000000e-01 : f32
    %37 = vector.broadcast %cst_29 : f32 to vector<8x32xf32>
    %38 = arith.addf %36, %37 : vector<8x32xf32>
    %39 = vector.extract_strided_slice %30 {offsets = [0, 32], sizes = [8, 32], strides = [1, 1]} : vector<8x128xf32> to vector<8x32xf32>
    %cst_30 = arith.constant 5.000000e-01 : f32
    %40 = vector.broadcast %cst_30 : f32 to vector<8x32xf32>
    %41 = arith.mulf %40, %39 : vector<8x32xf32>
    %42 = math.tanh %41 : vector<8x32xf32>
    %cst_31 = arith.constant 5.000000e-01 : f32
    %43 = vector.broadcast %cst_31 : f32 to vector<8x32xf32>
    %44 = arith.mulf %43, %42 : vector<8x32xf32>
    %cst_32 = arith.constant 5.000000e-01 : f32
    %45 = vector.broadcast %cst_32 : f32 to vector<8x32xf32>
    %46 = arith.addf %44, %45 : vector<8x32xf32>
    %47 = vector.extract_strided_slice %30 {offsets = [0, 64], sizes = [8, 32], strides = [1, 1]} : vector<8x128xf32> to vector<8x32xf32>
    %48 = math.tanh %47 : vector<8x32xf32>
    %49 = vector.extract_strided_slice %30 {offsets = [0, 96], sizes = [8, 32], strides = [1, 1]} : vector<8x128xf32> to vector<8x32xf32>
    %cst_33 = arith.constant 5.000000e-01 : f32
    %50 = vector.broadcast %cst_33 : f32 to vector<8x32xf32>
    %51 = arith.mulf %50, %49 : vector<8x32xf32>
    %52 = math.tanh %51 : vector<8x32xf32>
    %cst_34 = arith.constant 5.000000e-01 : f32
    %53 = vector.broadcast %cst_34 : f32 to vector<8x32xf32>
    %54 = arith.mulf %53, %52 : vector<8x32xf32>
    %cst_35 = arith.constant 5.000000e-01 : f32
    %55 = vector.broadcast %cst_35 : f32 to vector<8x32xf32>
    %56 = arith.addf %54, %55 : vector<8x32xf32>
    %57 = arith.mulf %46, %27 : vector<8x32xf32>
    %58 = arith.mulf %38, %48 : vector<8x32xf32>
    %59 = arith.addf %57, %58 : vector<8x32xf32>
    %60 = math.tanh %59 : vector<8x32xf32>
    %61 = arith.mulf %56, %60 : vector<8x32xf32>
    %c0_36 = arith.constant 0 : index
    %c0_37 = arith.constant 0 : index
    %62 = vector.load %arg18[%c0_36, %c0_37] : memref<48x32xf32, #tpu.memory_space<vmem>>, vector<8x32xf32>
    tpu.vector_store %arg18[%c0_36, %c0_37], %61 {strides = array<i32>} : memref<48x32xf32, #tpu.memory_space<vmem>>, vector<8x32xf32>,
    %63 = vector.extract_strided_slice %25 {offsets = [8, 0], sizes = [8, 128], strides = [1, 1]} : vector<48x128xf32> to vector<8x128xf32>
    %cst_38 = arith.constant dense<0.000000e+00> : vector<8x128xf32>
    %64 = tpu.matmul %61, %20, %cst_38 {dimension_numbers = #tpu.dot_dimension_numbers<[1], [0], [0], [1], [0, 0, 1, 1], [], []>} : vector<8x32xf32>, vector<32x128xf32>, vector<8x128xf32> -> vector<8x128xf32>
    %65 = arith.addf %63, %64 : vector<8x128xf32>
    %66 = vector.extract_strided_slice %65 {offsets = [0, 0], sizes = [8, 32], strides = [1, 1]} : vector<8x128xf32> to vector<8x32xf32>
    %cst_39 = arith.constant 5.000000e-01 : f32
    %67 = vector.broadcast %cst_39 : f32 to vector<8x32xf32>
    %68 = arith.mulf %67, %66 : vector<8x32xf32>
    %69 = math.tanh %68 : vector<8x32xf32>
    %cst_40 = arith.constant 5.000000e-01 : f32
    %70 = vector.broadcast %cst_40 : f32 to vector<8x32xf32>
    %71 = arith.mulf %70, %69 : vector<8x32xf32>
    %cst_41 = arith.constant 5.000000e-01 : f32
    %72 = vector.broadcast %cst_41 : f32 to vector<8x32xf32>
    %73 = arith.addf %71, %72 : vector<8x32xf32>
    %74 = vector.extract_strided_slice %65 {offsets = [0, 32], sizes = [8, 32], strides = [1, 1]} : vector<8x128xf32> to vector<8x32xf32>
    %cst_42 = arith.constant 5.000000e-01 : f32
    %75 = vector.broadcast %cst_42 : f32 to vector<8x32xf32>
    %76 = arith.mulf %75, %74 : vector<8x32xf32>
    %77 = math.tanh %76 : vector<8x32xf32>
    %cst_43 = arith.constant 5.000000e-01 : f32
    %78 = vector.broadcast %cst_43 : f32 to vector<8x32xf32>
    %79 = arith.mulf %78, %77 : vector<8x32xf32>
    %cst_44 = arith.constant 5.000000e-01 : f32
    %80 = vector.broadcast %cst_44 : f32 to vector<8x32xf32>
    %81 = arith.addf %79, %80 : vector<8x32xf32>
    %82 = vector.extract_strided_slice %65 {offsets = [0, 64], sizes = [8, 32], strides = [1, 1]} : vector<8x128xf32> to vector<8x32xf32>
    %83 = math.tanh %82 : vector<8x32xf32>
    %84 = vector.extract_strided_slice %65 {offsets = [0, 96], sizes = [8, 32], strides = [1, 1]} : vector<8x128xf32> to vector<8x32xf32>
    %cst_45 = arith.constant 5.000000e-01 : f32
    %85 = vector.broadcast %cst_45 : f32 to vector<8x32xf32>
    %86 = arith.mulf %85, %84 : vector<8x32xf32>
    %87 = math.tanh %86 : vector<8x32xf32>
    %cst_46 = arith.constant 5.000000e-01 : f32
    %88 = vector.broadcast %cst_46 : f32 to vector<8x32xf32>
    %89 = arith.mulf %88, %87 : vector<8x32xf32>
    %cst_47 = arith.constant 5.000000e-01 : f32
    %90 = vector.broadcast %cst_47 : f32 to vector<8x32xf32>
    %91 = arith.addf %89, %90 : vector<8x32xf32>
    %92 = arith.mulf %81, %59 : vector<8x32xf32>
    %93 = arith.mulf %73, %83 : vector<8x32xf32>
    %94 = arith.addf %92, %93 : vector<8x32xf32>
    %95 = math.tanh %94 : vector<8x32xf32>
    %96 = arith.mulf %91, %95 : vector<8x32xf32>
    %c8 = arith.constant 8 : index
    %c0_48 = arith.constant 0 : index
    %97 = vector.load %arg18[%c8, %c0_48] : memref<48x32xf32, #tpu.memory_space<vmem>>, vector<8x32xf32>
    tpu.vector_store %arg18[%c8, %c0_48], %96 {strides = array<i32>} : memref<48x32xf32, #tpu.memory_space<vmem>>, vector<8x32xf32>,
    %98 = vector.extract_strided_slice %25 {offsets = [16, 0], sizes = [8, 128], strides = [1, 1]} : vector<48x128xf32> to vector<8x128xf32>
    %cst_49 = arith.constant dense<0.000000e+00> : vector<8x128xf32>
    %99 = tpu.matmul %96, %20, %cst_49 {dimension_numbers = #tpu.dot_dimension_numbers<[1], [0], [0], [1], [0, 0, 1, 1], [], []>} : vector<8x32xf32>, vector<32x128xf32>, vector<8x128xf32> -> vector<8x128xf32>
    %100 = arith.addf %98, %99 : vector<8x128xf32>
    %101 = vector.extract_strided_slice %100 {offsets = [0, 0], sizes = [8, 32], strides = [1, 1]} : vector<8x128xf32> to vector<8x32xf32>
    %cst_50 = arith.constant 5.000000e-01 : f32
    %102 = vector.broadcast %cst_50 : f32 to vector<8x32xf32>
    %103 = arith.mulf %102, %101 : vector<8x32xf32>
    %104 = math.tanh %103 : vector<8x32xf32>
    %cst_51 = arith.constant 5.000000e-01 : f32
    %105 = vector.broadcast %cst_51 : f32 to vector<8x32xf32>
    %106 = arith.mulf %105, %104 : vector<8x32xf32>
    %cst_52 = arith.constant 5.000000e-01 : f32
    %107 = vector.broadcast %cst_52 : f32 to vector<8x32xf32>
    %108 = arith.addf %106, %107 : vector<8x32xf32>
    %109 = vector.extract_strided_slice %100 {offsets = [0, 32], sizes = [8, 32], strides = [1, 1]} : vector<8x128xf32> to vector<8x32xf32>
    %cst_53 = arith.constant 5.000000e-01 : f32
    %110 = vector.broadcast %cst_53 : f32 to vector<8x32xf32>
    %111 = arith.mulf %110, %109 : vector<8x32xf32>
    %112 = math.tanh %111 : vector<8x32xf32>
    %cst_54 = arith.constant 5.000000e-01 : f32
    %113 = vector.broadcast %cst_54 : f32 to vector<8x32xf32>
    %114 = arith.mulf %113, %112 : vector<8x32xf32>
    %cst_55 = arith.constant 5.000000e-01 : f32
    %115 = vector.broadcast %cst_55 : f32 to vector<8x32xf32>
    %116 = arith.addf %114, %115 : vector<8x32xf32>
    %117 = vector.extract_strided_slice %100 {offsets = [0, 64], sizes = [8, 32], strides = [1, 1]} : vector<8x128xf32> to vector<8x32xf32>
    %118 = math.tanh %117 : vector<8x32xf32>
    %119 = vector.extract_strided_slice %100 {offsets = [0, 96], sizes = [8, 32], strides = [1, 1]} : vector<8x128xf32> to vector<8x32xf32>
    %cst_56 = arith.constant 5.000000e-01 : f32
    %120 = vector.broadcast %cst_56 : f32 to vector<8x32xf32>
    %121 = arith.mulf %120, %119 : vector<8x32xf32>
    %122 = math.tanh %121 : vector<8x32xf32>
    %cst_57 = arith.constant 5.000000e-01 : f32
    %123 = vector.broadcast %cst_57 : f32 to vector<8x32xf32>
    %124 = arith.mulf %123, %122 : vector<8x32xf32>
    %cst_58 = arith.constant 5.000000e-01 : f32
    %125 = vector.broadcast %cst_58 : f32 to vector<8x32xf32>
    %126 = arith.addf %124, %125 : vector<8x32xf32>
    %127 = arith.mulf %116, %94 : vector<8x32xf32>
    %128 = arith.mulf %108, %118 : vector<8x32xf32>
    %129 = arith.addf %127, %128 : vector<8x32xf32>
    %130 = math.tanh %129 : vector<8x32xf32>
    %131 = arith.mulf %126, %130 : vector<8x32xf32>
    %c16 = arith.constant 16 : index
    %c0_59 = arith.constant 0 : index
    %132 = vector.load %arg18[%c16, %c0_59] : memref<48x32xf32, #tpu.memory_space<vmem>>, vector<8x32xf32>
    tpu.vector_store %arg18[%c16, %c0_59], %131 {strides = array<i32>} : memref<48x32xf32, #tpu.memory_space<vmem>>, vector<8x32xf32>,
    %133 = vector.extract_strided_slice %25 {offsets = [24, 0], sizes = [8, 128], strides = [1, 1]} : vector<48x128xf32> to vector<8x128xf32>
    %cst_60 = arith.constant dense<0.000000e+00> : vector<8x128xf32>
    %134 = tpu.matmul %131, %20, %cst_60 {dimension_numbers = #tpu.dot_dimension_numbers<[1], [0], [0], [1], [0, 0, 1, 1], [], []>} : vector<8x32xf32>, vector<32x128xf32>, vector<8x128xf32> -> vector<8x128xf32>
    %135 = arith.addf %133, %134 : vector<8x128xf32>
    %136 = vector.extract_strided_slice %135 {offsets = [0, 0], sizes = [8, 32], strides = [1, 1]} : vector<8x128xf32> to vector<8x32xf32>
    %cst_61 = arith.constant 5.000000e-01 : f32
    %137 = vector.broadcast %cst_61 : f32 to vector<8x32xf32>
    %138 = arith.mulf %137, %136 : vector<8x32xf32>
    %139 = math.tanh %138 : vector<8x32xf32>
    %cst_62 = arith.constant 5.000000e-01 : f32
    %140 = vector.broadcast %cst_62 : f32 to vector<8x32xf32>
    %141 = arith.mulf %140, %139 : vector<8x32xf32>
    %cst_63 = arith.constant 5.000000e-01 : f32
    %142 = vector.broadcast %cst_63 : f32 to vector<8x32xf32>
    %143 = arith.addf %141, %142 : vector<8x32xf32>
    %144 = vector.extract_strided_slice %135 {offsets = [0, 32], sizes = [8, 32], strides = [1, 1]} : vector<8x128xf32> to vector<8x32xf32>
    %cst_64 = arith.constant 5.000000e-01 : f32
    %145 = vector.broadcast %cst_64 : f32 to vector<8x32xf32>
    %146 = arith.mulf %145, %144 : vector<8x32xf32>
    %147 = math.tanh %146 : vector<8x32xf32>
    %cst_65 = arith.constant 5.000000e-01 : f32
    %148 = vector.broadcast %cst_65 : f32 to vector<8x32xf32>
    %149 = arith.mulf %148, %147 : vector<8x32xf32>
    %cst_66 = arith.constant 5.000000e-01 : f32
    %150 = vector.broadcast %cst_66 : f32 to vector<8x32xf32>
    %151 = arith.addf %149, %150 : vector<8x32xf32>
    %152 = vector.extract_strided_slice %135 {offsets = [0, 64], sizes = [8, 32], strides = [1, 1]} : vector<8x128xf32> to vector<8x32xf32>
    %153 = math.tanh %152 : vector<8x32xf32>
    %154 = vector.extract_strided_slice %135 {offsets = [0, 96], sizes = [8, 32], strides = [1, 1]} : vector<8x128xf32> to vector<8x32xf32>
    %cst_67 = arith.constant 5.000000e-01 : f32
    %155 = vector.broadcast %cst_67 : f32 to vector<8x32xf32>
    %156 = arith.mulf %155, %154 : vector<8x32xf32>
    %157 = math.tanh %156 : vector<8x32xf32>
    %cst_68 = arith.constant 5.000000e-01 : f32
    %158 = vector.broadcast %cst_68 : f32 to vector<8x32xf32>
    %159 = arith.mulf %158, %157 : vector<8x32xf32>
    %cst_69 = arith.constant 5.000000e-01 : f32
    %160 = vector.broadcast %cst_69 : f32 to vector<8x32xf32>
    %161 = arith.addf %159, %160 : vector<8x32xf32>
    %162 = arith.mulf %151, %129 : vector<8x32xf32>
    %163 = arith.mulf %143, %153 : vector<8x32xf32>
    %164 = arith.addf %162, %163 : vector<8x32xf32>
    %165 = math.tanh %164 : vector<8x32xf32>
    %166 = arith.mulf %161, %165 : vector<8x32xf32>
    %c24 = arith.constant 24 : index
    %c0_70 = arith.constant 0 : index
    %167 = vector.load %arg18[%c24, %c0_70] : memref<48x32xf32, #tpu.memory_space<vmem>>, vector<8x32xf32>
    tpu.vector_store %arg18[%c24, %c0_70], %166 {strides = array<i32>} : memref<48x32xf32, #tpu.memory_space<vmem>>, vector<8x32xf32>,
    %168 = vector.extract_strided_slice %25 {offsets = [32, 0], sizes = [8, 128], strides = [1, 1]} : vector<48x128xf32> to vector<8x128xf32>
    %cst_71 = arith.constant dense<0.000000e+00> : vector<8x128xf32>
    %169 = tpu.matmul %166, %20, %cst_71 {dimension_numbers = #tpu.dot_dimension_numbers<[1], [0], [0], [1], [0, 0, 1, 1], [], []>} : vector<8x32xf32>, vector<32x128xf32>, vector<8x128xf32> -> vector<8x128xf32>
    %170 = arith.addf %168, %169 : vector<8x128xf32>
    %171 = vector.extract_strided_slice %170 {offsets = [0, 0], sizes = [8, 32], strides = [1, 1]} : vector<8x128xf32> to vector<8x32xf32>
    %cst_72 = arith.constant 5.000000e-01 : f32
    %172 = vector.broadcast %cst_72 : f32 to vector<8x32xf32>
    %173 = arith.mulf %172, %171 : vector<8x32xf32>
    %174 = math.tanh %173 : vector<8x32xf32>
    %cst_73 = arith.constant 5.000000e-01 : f32
    %175 = vector.broadcast %cst_73 : f32 to vector<8x32xf32>
    %176 = arith.mulf %175, %174 : vector<8x32xf32>
    %cst_74 = arith.constant 5.000000e-01 : f32
    %177 = vector.broadcast %cst_74 : f32 to vector<8x32xf32>
    %178 = arith.addf %176, %177 : vector<8x32xf32>
    %179 = vector.extract_strided_slice %170 {offsets = [0, 32], sizes = [8, 32], strides = [1, 1]} : vector<8x128xf32> to vector<8x32xf32>
    %cst_75 = arith.constant 5.000000e-01 : f32
    %180 = vector.broadcast %cst_75 : f32 to vector<8x32xf32>
    %181 = arith.mulf %180, %179 : vector<8x32xf32>
    %182 = math.tanh %181 : vector<8x32xf32>
    %cst_76 = arith.constant 5.000000e-01 : f32
    %183 = vector.broadcast %cst_76 : f32 to vector<8x32xf32>
    %184 = arith.mulf %183, %182 : vector<8x32xf32>
    %cst_77 = arith.constant 5.000000e-01 : f32
    %185 = vector.broadcast %cst_77 : f32 to vector<8x32xf32>
    %186 = arith.addf %184, %185 : vector<8x32xf32>
    %187 = vector.extract_strided_slice %170 {offsets = [0, 64], sizes = [8, 32], strides = [1, 1]} : vector<8x128xf32> to vector<8x32xf32>
    %188 = math.tanh %187 : vector<8x32xf32>
    %189 = vector.extract_strided_slice %170 {offsets = [0, 96], sizes = [8, 32], strides = [1, 1]} : vector<8x128xf32> to vector<8x32xf32>
    %cst_78 = arith.constant 5.000000e-01 : f32
    %190 = vector.broadcast %cst_78 : f32 to vector<8x32xf32>
    %191 = arith.mulf %190, %189 : vector<8x32xf32>
    %192 = math.tanh %191 : vector<8x32xf32>
    %cst_79 = arith.constant 5.000000e-01 : f32
    %193 = vector.broadcast %cst_79 : f32 to vector<8x32xf32>
    %194 = arith.mulf %193, %192 : vector<8x32xf32>
    %cst_80 = arith.constant 5.000000e-01 : f32
    %195 = vector.broadcast %cst_80 : f32 to vector<8x32xf32>
    %196 = arith.addf %194, %195 : vector<8x32xf32>
    %197 = arith.mulf %186, %164 : vector<8x32xf32>
    %198 = arith.mulf %178, %188 : vector<8x32xf32>
    %199 = arith.addf %197, %198 : vector<8x32xf32>
    %200 = math.tanh %199 : vector<8x32xf32>
    %201 = arith.mulf %196, %200 : vector<8x32xf32>
    %c32 = arith.constant 32 : index
    %c0_81 = arith.constant 0 : index
    %202 = vector.load %arg18[%c32, %c0_81] : memref<48x32xf32, #tpu.memory_space<vmem>>, vector<8x32xf32>
    tpu.vector_store %arg18[%c32, %c0_81], %201 {strides = array<i32>} : memref<48x32xf32, #tpu.memory_space<vmem>>, vector<8x32xf32>,
    %203 = vector.extract_strided_slice %25 {offsets = [40, 0], sizes = [8, 128], strides = [1, 1]} : vector<48x128xf32> to vector<8x128xf32>
    %cst_82 = arith.constant dense<0.000000e+00> : vector<8x128xf32>
    %204 = tpu.matmul %201, %20, %cst_82 {dimension_numbers = #tpu.dot_dimension_numbers<[1], [0], [0], [1], [0, 0, 1, 1], [], []>} : vector<8x32xf32>, vector<32x128xf32>, vector<8x128xf32> -> vector<8x128xf32>
    %205 = arith.addf %203, %204 : vector<8x128xf32>
    %206 = vector.extract_strided_slice %205 {offsets = [0, 0], sizes = [8, 32], strides = [1, 1]} : vector<8x128xf32> to vector<8x32xf32>
    %cst_83 = arith.constant 5.000000e-01 : f32
    %207 = vector.broadcast %cst_83 : f32 to vector<8x32xf32>
    %208 = arith.mulf %207, %206 : vector<8x32xf32>
    %209 = math.tanh %208 : vector<8x32xf32>
    %cst_84 = arith.constant 5.000000e-01 : f32
    %210 = vector.broadcast %cst_84 : f32 to vector<8x32xf32>
    %211 = arith.mulf %210, %209 : vector<8x32xf32>
    %cst_85 = arith.constant 5.000000e-01 : f32
    %212 = vector.broadcast %cst_85 : f32 to vector<8x32xf32>
    %213 = arith.addf %211, %212 : vector<8x32xf32>
    %214 = vector.extract_strided_slice %205 {offsets = [0, 32], sizes = [8, 32], strides = [1, 1]} : vector<8x128xf32> to vector<8x32xf32>
    %cst_86 = arith.constant 5.000000e-01 : f32
    %215 = vector.broadcast %cst_86 : f32 to vector<8x32xf32>
    %216 = arith.mulf %215, %214 : vector<8x32xf32>
    %217 = math.tanh %216 : vector<8x32xf32>
    %cst_87 = arith.constant 5.000000e-01 : f32
    %218 = vector.broadcast %cst_87 : f32 to vector<8x32xf32>
    %219 = arith.mulf %218, %217 : vector<8x32xf32>
    %cst_88 = arith.constant 5.000000e-01 : f32
    %220 = vector.broadcast %cst_88 : f32 to vector<8x32xf32>
    %221 = arith.addf %219, %220 : vector<8x32xf32>
    %222 = vector.extract_strided_slice %205 {offsets = [0, 64], sizes = [8, 32], strides = [1, 1]} : vector<8x128xf32> to vector<8x32xf32>
    %223 = math.tanh %222 : vector<8x32xf32>
    %224 = vector.extract_strided_slice %205 {offsets = [0, 96], sizes = [8, 32], strides = [1, 1]} : vector<8x128xf32> to vector<8x32xf32>
    %cst_89 = arith.constant 5.000000e-01 : f32
    %225 = vector.broadcast %cst_89 : f32 to vector<8x32xf32>
    %226 = arith.mulf %225, %224 : vector<8x32xf32>
    %227 = math.tanh %226 : vector<8x32xf32>
    %cst_90 = arith.constant 5.000000e-01 : f32
    %228 = vector.broadcast %cst_90 : f32 to vector<8x32xf32>
    %229 = arith.mulf %228, %227 : vector<8x32xf32>
    %cst_91 = arith.constant 5.000000e-01 : f32
    %230 = vector.broadcast %cst_91 : f32 to vector<8x32xf32>
    %231 = arith.addf %229, %230 : vector<8x32xf32>
    %232 = arith.mulf %221, %199 : vector<8x32xf32>
    %233 = arith.mulf %213, %223 : vector<8x32xf32>
    %234 = arith.addf %232, %233 : vector<8x32xf32>
    %235 = math.tanh %234 : vector<8x32xf32>
    %236 = arith.mulf %231, %235 : vector<8x32xf32>
    %c40 = arith.constant 40 : index
    %c0_92 = arith.constant 0 : index
    %237 = vector.load %arg18[%c40, %c0_92] : memref<48x32xf32, #tpu.memory_space<vmem>>, vector<8x32xf32>
    tpu.vector_store %arg18[%c40, %c0_92], %236 {strides = array<i32>} : memref<48x32xf32, #tpu.memory_space<vmem>>, vector<8x32xf32>,
    %c0_93 = arith.constant 0 : index
    %c0_94 = arith.constant 0 : index
    %238 = vector.load %arg18[%c0_93, %c0_94] : memref<48x32xf32, #tpu.memory_space<vmem>>, vector<48x32xf32>
    %c0_95 = arith.constant 0 : index
    %c0_96 = arith.constant 0 : index
    %239 = vector.load %arg12[%c0_95, %c0_96] : memref<32x128xf32, #tpu.memory_space<vmem>>, vector<32x128xf32>
    %c0_97 = arith.constant 0 : index
    %c0_98 = arith.constant 0 : index
    %240 = vector.load %arg13[%c0_97, %c0_98] : memref<1x128xf32, #tpu.memory_space<vmem>>, vector<1x128xf32>
    %c0_99 = arith.constant 0 : index
    %c0_100 = arith.constant 0 : index
    %241 = vector.load %arg11[%c0_99, %c0_100] : memref<32x128xf32, #tpu.memory_space<vmem>>, vector<32x128xf32>
    %cst_101 = arith.constant dense<0.000000e+00> : vector<48x128xf32>
    %242 = tpu.matmul %238, %241, %cst_101 {dimension_numbers = #tpu.dot_dimension_numbers<[1], [0], [0], [1], [0, 0, 1, 1], [], []>} : vector<48x32xf32>, vector<32x128xf32>, vector<48x128xf32> -> vector<48x128xf32>
    %243 = vector.broadcast %240 : vector<1x128xf32> to vector<48x128xf32>
    %244 = arith.addf %242, %243 : vector<48x128xf32>
    %cst_102 = arith.constant 0.000000e+00 : f32
    %245 = vector.broadcast %cst_102 : f32 to vector<8x32xf32>
    %cst_103 = arith.constant 0.000000e+00 : f32
    %246 = vector.broadcast %cst_103 : f32 to vector<8x32xf32>
    %247 = vector.extract_strided_slice %244 {offsets = [0, 0], sizes = [8, 128], strides = [1, 1]} : vector<48x128xf32> to vector<8x128xf32>
    %cst_104 = arith.constant dense<0.000000e+00> : vector<8x128xf32>
    %248 = tpu.matmul %245, %239, %cst_104 {dimension_numbers = #tpu.dot_dimension_numbers<[1], [0], [0], [1], [0, 0, 1, 1], [], []>} : vector<8x32xf32>, vector<32x128xf32>, vector<8x128xf32> -> vector<8x128xf32>
    %249 = arith.addf %247, %248 : vector<8x128xf32>
    %250 = vector.extract_strided_slice %249 {offsets = [0, 0], sizes = [8, 32], strides = [1, 1]} : vector<8x128xf32> to vector<8x32xf32>
    %cst_105 = arith.constant 5.000000e-01 : f32
    %251 = vector.broadcast %cst_105 : f32 to vector<8x32xf32>
    %252 = arith.mulf %251, %250 : vector<8x32xf32>
    %253 = math.tanh %252 : vector<8x32xf32>
    %cst_106 = arith.constant 5.000000e-01 : f32
    %254 = vector.broadcast %cst_106 : f32 to vector<8x32xf32>
    %255 = arith.mulf %254, %253 : vector<8x32xf32>
    %cst_107 = arith.constant 5.000000e-01 : f32
    %256 = vector.broadcast %cst_107 : f32 to vector<8x32xf32>
    %257 = arith.addf %255, %256 : vector<8x32xf32>
    %258 = vector.extract_strided_slice %249 {offsets = [0, 32], sizes = [8, 32], strides = [1, 1]} : vector<8x128xf32> to vector<8x32xf32>
    %cst_108 = arith.constant 5.000000e-01 : f32
    %259 = vector.broadcast %cst_108 : f32 to vector<8x32xf32>
    %260 = arith.mulf %259, %258 : vector<8x32xf32>
    %261 = math.tanh %260 : vector<8x32xf32>
    %cst_109 = arith.constant 5.000000e-01 : f32
    %262 = vector.broadcast %cst_109 : f32 to vector<8x32xf32>
    %263 = arith.mulf %262, %261 : vector<8x32xf32>
    %cst_110 = arith.constant 5.000000e-01 : f32
    %264 = vector.broadcast %cst_110 : f32 to vector<8x32xf32>
    %265 = arith.addf %263, %264 : vector<8x32xf32>
    %266 = vector.extract_strided_slice %249 {offsets = [0, 64], sizes = [8, 32], strides = [1, 1]} : vector<8x128xf32> to vector<8x32xf32>
    %267 = math.tanh %266 : vector<8x32xf32>
    %268 = vector.extract_strided_slice %249 {offsets = [0, 96], sizes = [8, 32], strides = [1, 1]} : vector<8x128xf32> to vector<8x32xf32>
    %cst_111 = arith.constant 5.000000e-01 : f32
    %269 = vector.broadcast %cst_111 : f32 to vector<8x32xf32>
    %270 = arith.mulf %269, %268 : vector<8x32xf32>
    %271 = math.tanh %270 : vector<8x32xf32>
    %cst_112 = arith.constant 5.000000e-01 : f32
    %272 = vector.broadcast %cst_112 : f32 to vector<8x32xf32>
    %273 = arith.mulf %272, %271 : vector<8x32xf32>
    %cst_113 = arith.constant 5.000000e-01 : f32
    %274 = vector.broadcast %cst_113 : f32 to vector<8x32xf32>
    %275 = arith.addf %273, %274 : vector<8x32xf32>
    %276 = arith.mulf %265, %246 : vector<8x32xf32>
    %277 = arith.mulf %257, %267 : vector<8x32xf32>
    %278 = arith.addf %276, %277 : vector<8x32xf32>
    %279 = math.tanh %278 : vector<8x32xf32>
    %280 = arith.mulf %275, %279 : vector<8x32xf32>
    %281 = vector.extract_strided_slice %244 {offsets = [8, 0], sizes = [8, 128], strides = [1, 1]} : vector<48x128xf32> to vector<8x128xf32>
    %cst_114 = arith.constant dense<0.000000e+00> : vector<8x128xf32>
    %282 = tpu.matmul %280, %239, %cst_114 {dimension_numbers = #tpu.dot_dimension_numbers<[1], [0], [0], [1], [0, 0, 1, 1], [], []>} : vector<8x32xf32>, vector<32x128xf32>, vector<8x128xf32> -> vector<8x128xf32>
    %283 = arith.addf %281, %282 : vector<8x128xf32>
    %284 = vector.extract_strided_slice %283 {offsets = [0, 0], sizes = [8, 32], strides = [1, 1]} : vector<8x128xf32> to vector<8x32xf32>
    %cst_115 = arith.constant 5.000000e-01 : f32
    %285 = vector.broadcast %cst_115 : f32 to vector<8x32xf32>
    %286 = arith.mulf %285, %284 : vector<8x32xf32>
    %287 = math.tanh %286 : vector<8x32xf32>
    %cst_116 = arith.constant 5.000000e-01 : f32
    %288 = vector.broadcast %cst_116 : f32 to vector<8x32xf32>
    %289 = arith.mulf %288, %287 : vector<8x32xf32>
    %cst_117 = arith.constant 5.000000e-01 : f32
    %290 = vector.broadcast %cst_117 : f32 to vector<8x32xf32>
    %291 = arith.addf %289, %290 : vector<8x32xf32>
    %292 = vector.extract_strided_slice %283 {offsets = [0, 32], sizes = [8, 32], strides = [1, 1]} : vector<8x128xf32> to vector<8x32xf32>
    %cst_118 = arith.constant 5.000000e-01 : f32
    %293 = vector.broadcast %cst_118 : f32 to vector<8x32xf32>
    %294 = arith.mulf %293, %292 : vector<8x32xf32>
    %295 = math.tanh %294 : vector<8x32xf32>
    %cst_119 = arith.constant 5.000000e-01 : f32
    %296 = vector.broadcast %cst_119 : f32 to vector<8x32xf32>
    %297 = arith.mulf %296, %295 : vector<8x32xf32>
    %cst_120 = arith.constant 5.000000e-01 : f32
    %298 = vector.broadcast %cst_120 : f32 to vector<8x32xf32>
    %299 = arith.addf %297, %298 : vector<8x32xf32>
    %300 = vector.extract_strided_slice %283 {offsets = [0, 64], sizes = [8, 32], strides = [1, 1]} : vector<8x128xf32> to vector<8x32xf32>
    %301 = math.tanh %300 : vector<8x32xf32>
    %302 = vector.extract_strided_slice %283 {offsets = [0, 96], sizes = [8, 32], strides = [1, 1]} : vector<8x128xf32> to vector<8x32xf32>
    %cst_121 = arith.constant 5.000000e-01 : f32
    %303 = vector.broadcast %cst_121 : f32 to vector<8x32xf32>
    %304 = arith.mulf %303, %302 : vector<8x32xf32>
    %305 = math.tanh %304 : vector<8x32xf32>
    %cst_122 = arith.constant 5.000000e-01 : f32
    %306 = vector.broadcast %cst_122 : f32 to vector<8x32xf32>
    %307 = arith.mulf %306, %305 : vector<8x32xf32>
    %cst_123 = arith.constant 5.000000e-01 : f32
    %308 = vector.broadcast %cst_123 : f32 to vector<8x32xf32>
    %309 = arith.addf %307, %308 : vector<8x32xf32>
    %310 = arith.mulf %299, %278 : vector<8x32xf32>
    %311 = arith.mulf %291, %301 : vector<8x32xf32>
    %312 = arith.addf %310, %311 : vector<8x32xf32>
    %313 = math.tanh %312 : vector<8x32xf32>
    %314 = arith.mulf %309, %313 : vector<8x32xf32>
    %315 = vector.extract_strided_slice %244 {offsets = [16, 0], sizes = [8, 128], strides = [1, 1]} : vector<48x128xf32> to vector<8x128xf32>
    %cst_124 = arith.constant dense<0.000000e+00> : vector<8x128xf32>
    %316 = tpu.matmul %314, %239, %cst_124 {dimension_numbers = #tpu.dot_dimension_numbers<[1], [0], [0], [1], [0, 0, 1, 1], [], []>} : vector<8x32xf32>, vector<32x128xf32>, vector<8x128xf32> -> vector<8x128xf32>
    %317 = arith.addf %315, %316 : vector<8x128xf32>
    %318 = vector.extract_strided_slice %317 {offsets = [0, 0], sizes = [8, 32], strides = [1, 1]} : vector<8x128xf32> to vector<8x32xf32>
    %cst_125 = arith.constant 5.000000e-01 : f32
    %319 = vector.broadcast %cst_125 : f32 to vector<8x32xf32>
    %320 = arith.mulf %319, %318 : vector<8x32xf32>
    %321 = math.tanh %320 : vector<8x32xf32>
    %cst_126 = arith.constant 5.000000e-01 : f32
    %322 = vector.broadcast %cst_126 : f32 to vector<8x32xf32>
    %323 = arith.mulf %322, %321 : vector<8x32xf32>
    %cst_127 = arith.constant 5.000000e-01 : f32
    %324 = vector.broadcast %cst_127 : f32 to vector<8x32xf32>
    %325 = arith.addf %323, %324 : vector<8x32xf32>
    %326 = vector.extract_strided_slice %317 {offsets = [0, 32], sizes = [8, 32], strides = [1, 1]} : vector<8x128xf32> to vector<8x32xf32>
    %cst_128 = arith.constant 5.000000e-01 : f32
    %327 = vector.broadcast %cst_128 : f32 to vector<8x32xf32>
    %328 = arith.mulf %327, %326 : vector<8x32xf32>
    %329 = math.tanh %328 : vector<8x32xf32>
    %cst_129 = arith.constant 5.000000e-01 : f32
    %330 = vector.broadcast %cst_129 : f32 to vector<8x32xf32>
    %331 = arith.mulf %330, %329 : vector<8x32xf32>
    %cst_130 = arith.constant 5.000000e-01 : f32
    %332 = vector.broadcast %cst_130 : f32 to vector<8x32xf32>
    %333 = arith.addf %331, %332 : vector<8x32xf32>
    %334 = vector.extract_strided_slice %317 {offsets = [0, 64], sizes = [8, 32], strides = [1, 1]} : vector<8x128xf32> to vector<8x32xf32>
    %335 = math.tanh %334 : vector<8x32xf32>
    %336 = vector.extract_strided_slice %317 {offsets = [0, 96], sizes = [8, 32], strides = [1, 1]} : vector<8x128xf32> to vector<8x32xf32>
    %cst_131 = arith.constant 5.000000e-01 : f32
    %337 = vector.broadcast %cst_131 : f32 to vector<8x32xf32>
    %338 = arith.mulf %337, %336 : vector<8x32xf32>
    %339 = math.tanh %338 : vector<8x32xf32>
    %cst_132 = arith.constant 5.000000e-01 : f32
    %340 = vector.broadcast %cst_132 : f32 to vector<8x32xf32>
    %341 = arith.mulf %340, %339 : vector<8x32xf32>
    %cst_133 = arith.constant 5.000000e-01 : f32
    %342 = vector.broadcast %cst_133 : f32 to vector<8x32xf32>
    %343 = arith.addf %341, %342 : vector<8x32xf32>
    %344 = arith.mulf %333, %312 : vector<8x32xf32>
    %345 = arith.mulf %325, %335 : vector<8x32xf32>
    %346 = arith.addf %344, %345 : vector<8x32xf32>
    %347 = math.tanh %346 : vector<8x32xf32>
    %348 = arith.mulf %343, %347 : vector<8x32xf32>
    %349 = vector.extract_strided_slice %244 {offsets = [24, 0], sizes = [8, 128], strides = [1, 1]} : vector<48x128xf32> to vector<8x128xf32>
    %cst_134 = arith.constant dense<0.000000e+00> : vector<8x128xf32>
    %350 = tpu.matmul %348, %239, %cst_134 {dimension_numbers = #tpu.dot_dimension_numbers<[1], [0], [0], [1], [0, 0, 1, 1], [], []>} : vector<8x32xf32>, vector<32x128xf32>, vector<8x128xf32> -> vector<8x128xf32>
    %351 = arith.addf %349, %350 : vector<8x128xf32>
    %352 = vector.extract_strided_slice %351 {offsets = [0, 0], sizes = [8, 32], strides = [1, 1]} : vector<8x128xf32> to vector<8x32xf32>
    %cst_135 = arith.constant 5.000000e-01 : f32
    %353 = vector.broadcast %cst_135 : f32 to vector<8x32xf32>
    %354 = arith.mulf %353, %352 : vector<8x32xf32>
    %355 = math.tanh %354 : vector<8x32xf32>
    %cst_136 = arith.constant 5.000000e-01 : f32
    %356 = vector.broadcast %cst_136 : f32 to vector<8x32xf32>
    %357 = arith.mulf %356, %355 : vector<8x32xf32>
    %cst_137 = arith.constant 5.000000e-01 : f32
    %358 = vector.broadcast %cst_137 : f32 to vector<8x32xf32>
    %359 = arith.addf %357, %358 : vector<8x32xf32>
    %360 = vector.extract_strided_slice %351 {offsets = [0, 32], sizes = [8, 32], strides = [1, 1]} : vector<8x128xf32> to vector<8x32xf32>
    %cst_138 = arith.constant 5.000000e-01 : f32
    %361 = vector.broadcast %cst_138 : f32 to vector<8x32xf32>
    %362 = arith.mulf %361, %360 : vector<8x32xf32>
    %363 = math.tanh %362 : vector<8x32xf32>
    %cst_139 = arith.constant 5.000000e-01 : f32
    %364 = vector.broadcast %cst_139 : f32 to vector<8x32xf32>
    %365 = arith.mulf %364, %363 : vector<8x32xf32>
    %cst_140 = arith.constant 5.000000e-01 : f32
    %366 = vector.broadcast %cst_140 : f32 to vector<8x32xf32>
    %367 = arith.addf %365, %366 : vector<8x32xf32>
    %368 = vector.extract_strided_slice %351 {offsets = [0, 64], sizes = [8, 32], strides = [1, 1]} : vector<8x128xf32> to vector<8x32xf32>
    %369 = math.tanh %368 : vector<8x32xf32>
    %370 = vector.extract_strided_slice %351 {offsets = [0, 96], sizes = [8, 32], strides = [1, 1]} : vector<8x128xf32> to vector<8x32xf32>
    %cst_141 = arith.constant 5.000000e-01 : f32
    %371 = vector.broadcast %cst_141 : f32 to vector<8x32xf32>
    %372 = arith.mulf %371, %370 : vector<8x32xf32>
    %373 = math.tanh %372 : vector<8x32xf32>
    %cst_142 = arith.constant 5.000000e-01 : f32
    %374 = vector.broadcast %cst_142 : f32 to vector<8x32xf32>
    %375 = arith.mulf %374, %373 : vector<8x32xf32>
    %cst_143 = arith.constant 5.000000e-01 : f32
    %376 = vector.broadcast %cst_143 : f32 to vector<8x32xf32>
    %377 = arith.addf %375, %376 : vector<8x32xf32>
    %378 = arith.mulf %367, %346 : vector<8x32xf32>
    %379 = arith.mulf %359, %369 : vector<8x32xf32>
    %380 = arith.addf %378, %379 : vector<8x32xf32>
    %381 = math.tanh %380 : vector<8x32xf32>
    %382 = arith.mulf %377, %381 : vector<8x32xf32>
    %383 = vector.extract_strided_slice %244 {offsets = [32, 0], sizes = [8, 128], strides = [1, 1]} : vector<48x128xf32> to vector<8x128xf32>
    %cst_144 = arith.constant dense<0.000000e+00> : vector<8x128xf32>
    %384 = tpu.matmul %382, %239, %cst_144 {dimension_numbers = #tpu.dot_dimension_numbers<[1], [0], [0], [1], [0, 0, 1, 1], [], []>} : vector<8x32xf32>, vector<32x128xf32>, vector<8x128xf32> -> vector<8x128xf32>
    %385 = arith.addf %383, %384 : vector<8x128xf32>
    %386 = vector.extract_strided_slice %385 {offsets = [0, 0], sizes = [8, 32], strides = [1, 1]} : vector<8x128xf32> to vector<8x32xf32>
    %cst_145 = arith.constant 5.000000e-01 : f32
    %387 = vector.broadcast %cst_145 : f32 to vector<8x32xf32>
    %388 = arith.mulf %387, %386 : vector<8x32xf32>
    %389 = math.tanh %388 : vector<8x32xf32>
    %cst_146 = arith.constant 5.000000e-01 : f32
    %390 = vector.broadcast %cst_146 : f32 to vector<8x32xf32>
    %391 = arith.mulf %390, %389 : vector<8x32xf32>
    %cst_147 = arith.constant 5.000000e-01 : f32
    %392 = vector.broadcast %cst_147 : f32 to vector<8x32xf32>
    %393 = arith.addf %391, %392 : vector<8x32xf32>
    %394 = vector.extract_strided_slice %385 {offsets = [0, 32], sizes = [8, 32], strides = [1, 1]} : vector<8x128xf32> to vector<8x32xf32>
    %cst_148 = arith.constant 5.000000e-01 : f32
    %395 = vector.broadcast %cst_148 : f32 to vector<8x32xf32>
    %396 = arith.mulf %395, %394 : vector<8x32xf32>
    %397 = math.tanh %396 : vector<8x32xf32>
    %cst_149 = arith.constant 5.000000e-01 : f32
    %398 = vector.broadcast %cst_149 : f32 to vector<8x32xf32>
    %399 = arith.mulf %398, %397 : vector<8x32xf32>
    %cst_150 = arith.constant 5.000000e-01 : f32
    %400 = vector.broadcast %cst_150 : f32 to vector<8x32xf32>
    %401 = arith.addf %399, %400 : vector<8x32xf32>
    %402 = vector.extract_strided_slice %385 {offsets = [0, 64], sizes = [8, 32], strides = [1, 1]} : vector<8x128xf32> to vector<8x32xf32>
    %403 = math.tanh %402 : vector<8x32xf32>
    %404 = vector.extract_strided_slice %385 {offsets = [0, 96], sizes = [8, 32], strides = [1, 1]} : vector<8x128xf32> to vector<8x32xf32>
    %cst_151 = arith.constant 5.000000e-01 : f32
    %405 = vector.broadcast %cst_151 : f32 to vector<8x32xf32>
    %406 = arith.mulf %405, %404 : vector<8x32xf32>
    %407 = math.tanh %406 : vector<8x32xf32>
    %cst_152 = arith.constant 5.000000e-01 : f32
    %408 = vector.broadcast %cst_152 : f32 to vector<8x32xf32>
    %409 = arith.mulf %408, %407 : vector<8x32xf32>
    %cst_153 = arith.constant 5.000000e-01 : f32
    %410 = vector.broadcast %cst_153 : f32 to vector<8x32xf32>
    %411 = arith.addf %409, %410 : vector<8x32xf32>
    %412 = arith.mulf %401, %380 : vector<8x32xf32>
    %413 = arith.mulf %393, %403 : vector<8x32xf32>
    %414 = arith.addf %412, %413 : vector<8x32xf32>
    %415 = math.tanh %414 : vector<8x32xf32>
    %416 = arith.mulf %411, %415 : vector<8x32xf32>
    %417 = vector.extract_strided_slice %244 {offsets = [40, 0], sizes = [8, 128], strides = [1, 1]} : vector<48x128xf32> to vector<8x128xf32>
    %cst_154 = arith.constant dense<0.000000e+00> : vector<8x128xf32>
    %418 = tpu.matmul %416, %239, %cst_154 {dimension_numbers = #tpu.dot_dimension_numbers<[1], [0], [0], [1], [0, 0, 1, 1], [], []>} : vector<8x32xf32>, vector<32x128xf32>, vector<8x128xf32> -> vector<8x128xf32>
    %419 = arith.addf %417, %418 : vector<8x128xf32>
    %420 = vector.extract_strided_slice %419 {offsets = [0, 0], sizes = [8, 32], strides = [1, 1]} : vector<8x128xf32> to vector<8x32xf32>
    %cst_155 = arith.constant 5.000000e-01 : f32
    %421 = vector.broadcast %cst_155 : f32 to vector<8x32xf32>
    %422 = arith.mulf %421, %420 : vector<8x32xf32>
    %423 = math.tanh %422 : vector<8x32xf32>
    %cst_156 = arith.constant 5.000000e-01 : f32
    %424 = vector.broadcast %cst_156 : f32 to vector<8x32xf32>
    %425 = arith.mulf %424, %423 : vector<8x32xf32>
    %cst_157 = arith.constant 5.000000e-01 : f32
    %426 = vector.broadcast %cst_157 : f32 to vector<8x32xf32>
    %427 = arith.addf %425, %426 : vector<8x32xf32>
    %428 = vector.extract_strided_slice %419 {offsets = [0, 32], sizes = [8, 32], strides = [1, 1]} : vector<8x128xf32> to vector<8x32xf32>
    %cst_158 = arith.constant 5.000000e-01 : f32
    %429 = vector.broadcast %cst_158 : f32 to vector<8x32xf32>
    %430 = arith.mulf %429, %428 : vector<8x32xf32>
    %431 = math.tanh %430 : vector<8x32xf32>
    %cst_159 = arith.constant 5.000000e-01 : f32
    %432 = vector.broadcast %cst_159 : f32 to vector<8x32xf32>
    %433 = arith.mulf %432, %431 : vector<8x32xf32>
    %cst_160 = arith.constant 5.000000e-01 : f32
    %434 = vector.broadcast %cst_160 : f32 to vector<8x32xf32>
    %435 = arith.addf %433, %434 : vector<8x32xf32>
    %436 = vector.extract_strided_slice %419 {offsets = [0, 64], sizes = [8, 32], strides = [1, 1]} : vector<8x128xf32> to vector<8x32xf32>
    %437 = math.tanh %436 : vector<8x32xf32>
    %438 = vector.extract_strided_slice %419 {offsets = [0, 96], sizes = [8, 32], strides = [1, 1]} : vector<8x128xf32> to vector<8x32xf32>
    %cst_161 = arith.constant 5.000000e-01 : f32
    %439 = vector.broadcast %cst_161 : f32 to vector<8x32xf32>
    %440 = arith.mulf %439, %438 : vector<8x32xf32>
    %441 = math.tanh %440 : vector<8x32xf32>
    %cst_162 = arith.constant 5.000000e-01 : f32
    %442 = vector.broadcast %cst_162 : f32 to vector<8x32xf32>
    %443 = arith.mulf %442, %441 : vector<8x32xf32>
    %cst_163 = arith.constant 5.000000e-01 : f32
    %444 = vector.broadcast %cst_163 : f32 to vector<8x32xf32>
    %445 = arith.addf %443, %444 : vector<8x32xf32>
    %446 = arith.mulf %435, %414 : vector<8x32xf32>
    %447 = arith.mulf %427, %437 : vector<8x32xf32>
    %448 = arith.addf %446, %447 : vector<8x32xf32>
    %449 = math.tanh %448 : vector<8x32xf32>
    %450 = arith.mulf %445, %449 : vector<8x32xf32>
    %c0_164 = arith.constant 0 : index
    %c0_165 = arith.constant 0 : index
    %451 = vector.load %arg14[%c0_164, %c0_165] : memref<32x1xf32, #tpu.memory_space<vmem>>, vector<32x1xf32>
    %cst_166 = arith.constant dense<0.000000e+00> : vector<8x1xf32>
    %452 = tpu.matmul %450, %451, %cst_166 {dimension_numbers = #tpu.dot_dimension_numbers<[1], [0], [0], [1], [0, 0, 1, 1], [], []>} : vector<8x32xf32>, vector<32x1xf32>, vector<8x1xf32> -> vector<8x1xf32>
    %c0_167 = arith.constant 0 : index
    %c0_168 = arith.constant 0 : index
    %453 = vector.load %arg15[%c0_167, %c0_168] : memref<1x1xf32, #tpu.memory_space<vmem>>, vector<1x1xf32>
    %454 = vector.broadcast %453 : vector<1x1xf32> to vector<8x1xf32>
    %455 = arith.addf %452, %454 : vector<8x1xf32>
    %c0_169 = arith.constant 0 : index
    %c0_170 = arith.constant 0 : index
    %456 = vector.load %arg17[%c0_169, %c0_170] : memref<8x1xf32, #tpu.memory_space<vmem>>, vector<8x1xf32>
    tpu.vector_store %arg17[%c0_169, %c0_170], %455 {strides = array<i32>} : memref<8x1xf32, #tpu.memory_space<vmem>>, vector<8x1xf32>,
    return
  }
  func.func @transform_0(%arg0: i32) -> (i32, i32) {
    %c0_i32 = arith.constant 0 : i32
    %c0_i32_0 = arith.constant 0 : i32
    %c0_i32_1 = arith.constant 0 : i32
    return %c0_i32, %c0_i32_0 : i32, i32
  }
  func.func @transform_1(%arg0: i32) -> (i32, i32) {
    %c0_i32 = arith.constant 0 : i32
    %c0_i32_0 = arith.constant 0 : i32
    %c0_i32_1 = arith.constant 0 : i32
    return %c0_i32, %c0_i32_0 : i32, i32
  }
  func.func @transform_2(%arg0: i32) -> (i32, i32) {
    %c0_i32 = arith.constant 0 : i32
    %c0_i32_0 = arith.constant 0 : i32
    %c0_i32_1 = arith.constant 0 : i32
    return %c0_i32, %c0_i32_0 : i32, i32
  }
  func.func @transform_3(%arg0: i32) -> (i32, i32) {
    %c0_i32 = arith.constant 0 : i32
    %c0_i32_0 = arith.constant 0 : i32
    %c0_i32_1 = arith.constant 0 : i32
    return %c0_i32, %c0_i32_0 : i32, i32
  }
  func.func @transform_4(%arg0: i32) -> (i32, i32) {
    %c0_i32 = arith.constant 0 : i32
    %c0_i32_0 = arith.constant 0 : i32
    %c0_i32_1 = arith.constant 0 : i32
    return %c0_i32, %c0_i32_0 : i32, i32
  }
  func.func @transform_5(%arg0: i32) -> (i32, i32) {
    %c0_i32 = arith.constant 0 : i32
    %c0_i32_0 = arith.constant 0 : i32
    %c0_i32_1 = arith.constant 0 : i32
    return %c0_i32, %c0_i32_0 : i32, i32
  }
  func.func @transform_6(%arg0: i32) -> (i32, i32) {
    %c0_i32 = arith.constant 0 : i32
    %c0_i32_0 = arith.constant 0 : i32
    %c0_i32_1 = arith.constant 0 : i32
    return %c0_i32, %c0_i32_0 : i32, i32
  }
  func.func @transform_7(%arg0: i32) -> (i32, i32) {
    %c0_i32 = arith.constant 0 : i32
    %c0_i32_0 = arith.constant 0 : i32
    %c0_i32_1 = arith.constant 0 : i32
    return %c0_i32, %c0_i32_0 : i32, i32
  }
  func.func @transform_8(%arg0: i32) -> (i32, i32) {
    %c0_i32 = arith.constant 0 : i32
    %c0_i32_0 = arith.constant 0 : i32
    %c0_i32_1 = arith.constant 0 : i32
    return %c0_i32, %c0_i32_0 : i32, i32
  }
  func.func @transform_9(%arg0: i32) -> (i32, i32) {
    %c0_i32 = arith.constant 0 : i32
    %c0_i32_0 = arith.constant 0 : i32
    %c0_i32_1 = arith.constant 0 : i32
    return %c0_i32, %c0_i32_0 : i32, i32
  }
  func.func @transform_10(%arg0: i32) -> (i32, i32) {
    %c0_i32 = arith.constant 0 : i32
    %c0_i32_0 = arith.constant 0 : i32
    %c0_i32_1 = arith.constant 0 : i32
    return %c0_i32, %c0_i32_0 : i32, i32
  }
  func.func @transform_11(%arg0: i32) -> (i32, i32) {
    %c0_i32 = arith.constant 0 : i32
    %c0_i32_0 = arith.constant 0 : i32
    %c0_i32_1 = arith.constant 0 : i32
    return %c0_i32, %c0_i32_0 : i32, i32
  }
  func.func @transform_12(%arg0: i32) -> (i32, i32) {
    %c0_i32 = arith.constant 0 : i32
    %c0_i32_0 = arith.constant 0 : i32
    %c0_i32_1 = arith.constant 0 : i32
    return %c0_i32, %c0_i32_0 : i32, i32
  }
  func.func @transform_13(%arg0: i32) -> (i32, i32) {
    %c0_i32 = arith.constant 0 : i32
    %c0_i32_0 = arith.constant 0 : i32
    %c0_i32_1 = arith.constant 0 : i32
    return %c0_i32, %c0_i32_0 : i32, i32
  }
  func.func @transform_14(%arg0: i32) -> (i32, i32) {
    %c0_i32 = arith.constant 0 : i32
    %c0_i32_0 = arith.constant 0 : i32
    %c0_i32_1 = arith.constant 0 : i32
    return %c0_i32, %c0_i32_0 : i32, i32
  }
  func.func @transform_15(%arg0: i32) -> (i32, i32) {
    %c0_i32 = arith.constant 0 : i32
    %c0_i32_0 = arith.constant 0 : i32
    %c0_i32_1 = arith.constant 0 : i32
    return %c0_i32, %c0_i32_0 : i32, i32
  }
  func.func @transform_16(%arg0: i32) -> (i32, i32) {
    %c0_i32 = arith.constant 0 : i32
    %c0_i32_0 = arith.constant 0 : i32
    %c0_i32_1 = arith.constant 0 : i32
    return %c0_i32, %c0_i32_0 : i32, i32
  }
}

</mosaic_0001>

<bundles_post_ra>
// kernel: tpu_custom_call.1
= control target key start
LH: loop header
LB: loop body
LE: loop exit
PB: predicated region body
PF: predicated region fallthrough
CT: control target
= control target key end

     0   :  { %vm79_vm0 = vcmask 785408   ;;  %vm209_vm1 = vcmask 195584   ;;  %vm356_vm2 = vcmask 1045504   ;;  %vm337_vm3 = vcmask 48128   ;;  %s3134_s1 = inlined_call_operand.vmem [shape: f32[96,24], index: 1, kind: input, shape index: {}]   ;;  %s3135_s0 = inlined_call_operand.vmem [shape: f32[48,96], index: 0, kind: input, shape index: {}]   ;;  %s3136_s3 = inlined_call_operand.vmem [shape: f32[24,6], index: 3, kind: input, shape index: {}]   ;;  %s3137_s2 = inlined_call_operand.vmem [shape: f32[1,24], index: 2, kind: input, shape index: {}]   ;;  %s3138_s5 = inlined_call_operand.vmem [shape: f32[6,32], index: 5, kind: input, shape index: {}]   ;;  %s3139_s4 = inlined_call_operand.vmem [shape: f32[1,6], index: 4, kind: input, shape index: {}]   ;;  %s3140_s7 = inlined_call_operand.vmem [shape: f32[32,128], index: 7, kind: input, shape index: {}]   ;;  %s3141_s8 = inlined_call_operand.vmem [shape: f32[32,128], index: 8, kind: input, shape index: {}]   ;;  %s3142_s6 = inlined_call_operand.vmem [shape: f32[1,32], index: 6, kind: input, shape index: {}]   ;;  %s3143_s15 = inlined_call_operand.vmem [shape: f32[48,32], index: 15, kind: output, shape index: {0}]   ;;  %s3144_s9 = inlined_call_operand.vmem [shape: f32[1,128], index: 9, kind: input, shape index: {}]   ;;  %s3145_s10 = inlined_call_operand.vmem [shape: f32[32,128], index: 10, kind: input, shape index: {}]   ;;  %s3146_s11 = inlined_call_operand.vmem [shape: f32[32,128], index: 11, kind: input, shape index: {}]   ;;  %s3147_s12 = inlined_call_operand.vmem [shape: f32[1,128], index: 12, kind: input, shape index: {}]   ;;  %s3148_s13 = inlined_call_operand.vmem [shape: f32[32,1], index: 13, kind: input, shape index: {}]   ;;  %s3149_s14 = inlined_call_operand.<no memory space> [shape: f32[1,1], index: 14, kind: input, shape index: {}]   ;;  %s3150_s16 = inlined_call_operand.vmem [shape: f32[8,1], index: 16, kind: output, shape index: {1}]  }
   0x1   :  { %3152 = sst [smem:[#allocation4_spill]] %s3134_s1  ;;  %v54_v8 = vld [vmem:[%s3135_s0] sm:$0xff]  ;;  %v55_v19 = vld [vmem:[%s3135_s0 + $0x8] sm:$0xff]  ;;  %v56_v20 = vld [vmem:[%s3135_s0 + $0x10] sm:$0xff]  ;;  %vm2649_vm4 = vmmov 0   ;;  %vm461_vm5 = vcmask 261120  }
   0x2   :  { %s3153_s23 = sld [smem:[#allocation4_spill]]  ;;  %2201 = vmatprep.mubr.msk.f32.mxu0 %vm79_vm0, %v54_v8  ;;  %v57_v21 = vld [vmem:[%s3135_s0 + $0x18] sm:$0xff]  ;;  %v58_v22 = vld [vmem:[%s3135_s0 + $0x20] sm:$0xff]  ;;  %v59_v23 = vld [vmem:[%s3135_s0 + $0x28] sm:$0xff]  ;;  %vm2000_vm6 = vcmask 7168  }
   0x3   :  { %v199_v24 = vld [vmem:[%s3136_s3] sm:$0xff]  ;;  %v200_v25 = vld [vmem:[%s3136_s3 + $0x8] sm:$0xff]  ;;  %v201_v27 = vld [vmem:[%s3136_s3 + $0x10] sm:$0xff] }
   0x4   :  { %v2437_v26 = vpack.c.bf16 %v200_v25, %v199_v24  ;;  %v2010_v28 = vld [vmem:[%s3137_s2] ss:$0 sm:$0xff] }
   0x5   :  { %v329_v47 = vld [vmem:[%s3138_s5] sm:$0x3f] }
   0x6   :  { %2438 = vmatprep.subr.bf16.mxu1 %v2437_v26  ;;  %v2017_v48 = vld [vmem:[%s3139_s4] ss:$0 sm:$0xff] }
   0x7   :  { %2440 = vmatpush3.bf16.msra.mxu1 %v2437_v26 }
   0x8   :  { %v60_v0 = vld [vmem:[%s3153_s23] sm:$0xff]  ;;  %v61_v1 = vld [vmem:[%s3153_s23 + $0x8] sm:$0xff]  ;;  %v62_v2 = vld [vmem:[%s3153_s23 + $0x10] sm:$0xff]  ;;  %2214 = vmatprep.subr.mxu1 %v201_v27 }
   0x9   :  { %v2413_v3 = vpack.c.bf16 %v61_v1, %v60_v0  ;;  %v63_v4 = vld [vmem:[%s3153_s23 + $0x18] sm:$0xff]  ;;  %v64_v6 = vld [vmem:[%s3153_s23 + $0x20] sm:$0xff]  ;;  %v65_v7 = vld [vmem:[%s3153_s23 + $0x28] sm:$0xff] }
   0xa   :  { %v2417_v5 = vpack.c.bf16 %v63_v4, %v62_v2  ;;  %v2421_v9 = vpack.c.bf16 %v65_v7, %v64_v6  ;;  %v66_v10 = vld [vmem:[%s3153_s23 + $0x30] sm:$0xff]  ;;  %v67_v11 = vld [vmem:[%s3153_s23 + $0x38] sm:$0xff]  ;;  %v68_v13 = vld [vmem:[%s3153_s23 + $0x40] sm:$0xff] }
   0xb   :  { %2414 = vmatprep.subr.bf16.mxu0 %v2413_v3  ;;  %v2425_v12 = vpack.c.bf16 %v67_v11, %v66_v10  ;;  %v69_v14 = vld [vmem:[%s3153_s23 + $0x48] sm:$0xff]  ;;  %v70_v16 = vld [vmem:[%s3153_s23 + $0x50] sm:$0xff]  ;;  %v71_v17 = vld [vmem:[%s3153_s23 + $0x58] sm:$0xff]  ;;  %2215 = vmatpush3.msra.mxu1 %v201_v27  ;;  %v2648_v11 = vmov 0.0|0.0  }
   0xc   :  { %2416 = vmatpush3.bf16.msra.mxu0 %v2413_v3  ;;  %v2429_v15 = vpack.c.bf16 %v69_v14, %v68_v13  ;;  %v2433_v18 = vpack.c.bf16 %v71_v17, %v70_v16  ;;  %2225 = vmatprep.subr.msk.mxu1 %vm356_vm2, %v329_v47  ;;  %v473_v3 = vld [vmem:[%s3140_s7] sm:$0xff]  ;;  %v474_v4 = vld [vmem:[%s3140_s7 + $0x8] sm:$0xff]  ;;  %v476_v10 = vld [vmem:[%s3140_s7 + $0x18] sm:$0xff]  ;;  %v2650_v16 = vmov 0.0  }
   0xd   :  { %2418 = vmatprep.subr.bf16.mxu0 %v2417_v5  ;;  %v468_v6 = vld [vmem:[%s3141_s8] sm:$0xff]  ;;  %v469_v7 = vld [vmem:[%s3141_s8 + $0x8] sm:$0xff]  ;;  %v470_v13 = vld [vmem:[%s3141_s8 + $0x10] sm:$0xff] }
   0xe   :  { %v2840_v8 = vpack.c.bf16 %v469_v7, %v468_v6  ;;  %v471_v14 = vld [vmem:[%s3141_s8 + $0x18] sm:$0xff]  ;;  %v2024_v17 = vld [vmem:[%s3142_s6] ss:$0 sm:$0xff] }
  0x10   :  { %2420 = vmatpush3.bf16.msra.mxu0 %v2417_v5  ;;  %v2441_v5 = vpack.c.bf16 %v474_v4, %v473_v3 }
  0x11   :  { %2422 = vmatprep.subr.bf16.mxu0 %v2421_v9 }
  0x14   :  { %2424 = vmatpush3.bf16.msra.mxu0 %v2421_v9  ;;  %v475_v9 = vld [vmem:[%s3140_s7 + $0x10] sm:$0xff] }
  0x15   :  { %2426 = vmatprep.subr.bf16.mxu0 %v2425_v12 }
  0x18   :  { %2428 = vmatpush3.bf16.msra.mxu0 %v2425_v12  ;;  %v2445_v12 = vpack.c.bf16 %v476_v10, %v475_v9 }
  0x19   :  { %2430 = vmatprep.subr.bf16.mxu0 %v2429_v15 }
  0x1c   :  { %2432 = vmatpush3.bf16.msra.mxu0 %v2429_v15  ;;  %v2857_v15 = vpack.c.bf16 %v471_v14, %v470_v13 }
  0x1d   :  { %2434 = vmatprep.subr.bf16.mxu0 %v2433_v18 }
  0x20   :  { %2436 = vmatpush3.bf16.msra.mxu0 %v2433_v18 }
  0x21   :  { %2449 = vmatprep.subr.bf16.mxu0 %v2648_v11 }
  0x23   :  { %2202 = vmatmul.mubr.msk.f32.vlgmr.msra.gmra.mrb[0].mxu0 %vm79_vm0, %v55_v19 }
  0x24   :  { %2204 = vmatprep.mubr.msk.f32.mxu0 %vm79_vm0, %v56_v20  ;;  %2451 = vmatpush3.bf16.msra.mxu0 %v2840_v8 }
  0x25   :  { %2452 = vmatprep.subr.bf16.mxu0 %v2648_v11 }
  0x27   :  { %2205 = vmatmul.mubr.msk.f32.gmra.mrb[2].mxu0 %vm79_vm0, %v57_v21 }
  0x28   :  { %2207 = vmatprep.mubr.msk.f32.mxu0 %vm79_vm0, %v58_v22  ;;  %2454 = vmatpush3.bf16.msra.mxu0 %v2857_v15 }
  0x29   :  { %2461 = vmatprep.subr.bf16.mxu0 %v2648_v11 }
  0x2b   :  { %2208 = vmatmul.mubr.msk.f32.gmra.mrb[4].mxu0 %vm79_vm0, %v59_v23 }
  0x2c   :  { %2261 = vmatprep.mubr.msk.f32.mxu0 %vm2649_vm4, %v2650_v16 }
  0x2f   :  { %2262 = vmatmul.mubr.f32.vlgmr.msra.gmra.mrb[6].mxu0 %v2650_v16 }
  0x30   :  { %2463 = vmatpush3.bf16.msra.mxu0 %v2840_v8  ;;  %2283 = vmatprep.mubr.msk.f32.mxu0 %vm2649_vm4, %v2650_v16 }
  0x31   :  { %2464 = vmatprep.subr.bf16.mxu0 %v2648_v11 }
  0x34   :  { %2466 = vmatpush3.bf16.msra.mxu0 %v2857_v15 }
  0x35   :  { %2473 = vmatprep.subr.bf16.mxu0 %v2648_v11 }
  0xf6   :  { %v2203_v29 = vpop.f32.mrb[0].mxu0 }
  0xf7   :  { %v170_v30 = vadd.f32 %v2203_v29, %v2010_v28  ;;  %v164_v31 = vpop.f32.mrb[1].mxu0 }
  0xf8   :  { %v165_v32 = vadd.f32 %v2010_v28, %v164_v31 }
  0xfa   :  { %2540 = vtanh.f32 %v165_v32  ;;  %v2206_v35 = vpop.f32.mrb[2].mxu0 }
  0xfb   :  { %2542 = vtanh.f32 %v170_v30  ;;  %v180_v36 = vadd.f32 %v2206_v35, %v2010_v28  ;;  %v174_v37 = vpop.f32.mrb[3].mxu0 }
  0xfc   :  { %v175_v38 = vadd.f32 %v2010_v28, %v174_v37 }
  0xfd   :  { %2544 = vtanh.f32 %v180_v36 }
  0xfe   :  { %2546 = vtanh.f32 %v175_v38  ;;  %v2209_v39 = vpop.f32.mrb[4].mxu0  ;;  %v2913_v38 = vld [vmem:[%s3144_s9] ss:$0 sm:$0xff]  ;;  %s2652_s9 = smov 32  }
  0xff   :  { %v190_v40 = vadd.f32 %v2209_v39, %v2010_v28  ;;  %v184_v41 = vpop.f32.mrb[5].mxu0 }
 0x100   :  { %v185_v42 = vadd.f32 %v2010_v28, %v184_v41 }
 0x101   :  { %2548 = vtanh.f32 %v190_v40 }
 0x102   :  { %2550 = vtanh.f32 %v185_v42  ;;  %v665_v35 = vpop.f32.mrb[6].mxu0 }
 0x103   :  { %v2263_v37 = vpop.f32.mrb[7].mxu0 }
 0x104   :  { %v2541_v33 = vpop.eup %2540 }
 0x105   :  { %v2543_v34 = vpop.eup %2542  ;;  %2216 = vmatprep.mubr.msk.f32.mxu1 %vm209_vm1, %v2541_v33 }
 0x106   :  { %2217 = vmatmul.mubr.msk.f32.vlgmr.msra.gmra.mrb[0].mxu1 %vm209_vm1, %v2543_v34 }
 0x107   :  { %v2545_v43 = vpop.eup %2544  ;;  %2226 = vmatpush3.msk.msra.mxu1 %vm356_vm2, %v329_v47 }
 0x108   :  { %v2547_v44 = vpop.eup %2546  ;;  %2442 = vmatprep.subr.bf16.mxu1 %v2441_v5 }
 0x109   :  { %2219 = vmatprep.mubr.msk.f32.mxu1 %vm209_vm1, %v2547_v44 }
 0x10a   :  { %2220 = vmatmul.mubr.msk.f32.gmra.mrb[2].mxu1 %vm209_vm1, %v2545_v43 }
 0x10b   :  { %v2549_v45 = vpop.eup %2548 }
 0x10c   :  { %v2551_v46 = vpop.eup %2550 }
 0x10d   :  { %2222 = vmatprep.mubr.msk.f32.mxu1 %vm209_vm1, %v2551_v46 }
 0x10e   :  { %2223 = vmatmul.mubr.msk.f32.gmra.mrb[4].mxu1 %vm209_vm1, %v2549_v45 }
 0x1d9   :  { %v2218_v49 = vpop.f32.mrb[0].mxu1 }
 0x1da   :  { %v300_v50 = vadd.f32 %v2218_v49, %v2017_v48  ;;  %v294_v51 = vpop.f32.mrb[1].mxu1 }
 0x1db   :  { %v295_v52 = vadd.f32 %v2017_v48, %v294_v51 }
 0x1dd   :  { %2552 = vtanh.f32 %v295_v52  ;;  %v2221_v55 = vpop.f32.mrb[2].mxu1 }
 0x1de   :  { %2554 = vtanh.f32 %v300_v50  ;;  %v310_v56 = vadd.f32 %v2221_v55, %v2017_v48  ;;  %v304_v57 = vpop.f32.mrb[3].mxu1 }
 0x1df   :  { %v305_v58 = vadd.f32 %v2017_v48, %v304_v57 }
 0x1e0   :  { %2556 = vtanh.f32 %v310_v56 }
 0x1e1   :  { %2558 = vtanh.f32 %v305_v58  ;;  %v2224_v59 = vpop.f32.mrb[4].mxu1 }
 0x1e2   :  { %v320_v60 = vadd.f32 %v2224_v59, %v2017_v48  ;;  %v314_v61 = vpop.f32.mrb[5].mxu1 }
 0x1e3   :  { %v315_v62 = vadd.f32 %v2017_v48, %v314_v61 }
 0x1e4   :  { %2560 = vtanh.f32 %v320_v60 }
 0x1e5   :  { %2562 = vtanh.f32 %v315_v62 }
 0x1e7   :  { %v2553_v53 = vpop.eup %2552 }
 0x1e8   :  { %v2555_v54 = vpop.eup %2554  ;;  %2227 = vmatprep.mubr.msk.f32.mxu1 %vm337_vm3, %v2553_v53 }
 0x1e9   :  { %2228 = vmatmul.mubr.msk.f32.vlgmr.msra.gmra.mrb[6].mxu1 %vm337_vm3, %v2555_v54 }
 0x1ea   :  { %v2557_v63 = vpop.eup %2556  ;;  %2444 = vmatpush3.bf16.msra.mxu1 %v2441_v5 }
 0x1eb   :  { %v2559_v0 = vpop.eup %2558  ;;  %2446 = vmatprep.subr.bf16.mxu1 %v2445_v12 }
 0x1ec   :  { %2230 = vmatprep.mubr.msk.f32.mxu1 %vm337_vm3, %v2559_v0 }
 0x1ed   :  { %2231 = vmatmul.mubr.msk.f32.gmra.mrb[8].mxu1 %vm337_vm3, %v2557_v63 }
 0x1ee   :  { %v2561_v1 = vpop.eup %2560  ;;  %2448 = vmatpush3.bf16.msra.mxu1 %v2445_v12 }
 0x1ef   :  { %v2563_v2 = vpop.eup %2562  ;;  %2455 = vmatprep.subr.bf16.mxu1 %v2648_v11 }
 0x1f0   :  { %2233 = vmatprep.mubr.msk.f32.mxu1 %vm337_vm3, %v2563_v2 }
 0x1f1   :  { %2234 = vmatmul.mubr.msk.f32.gmra.mrb[10].mxu1 %vm337_vm3, %v2561_v1 }
 0x2bc   :  { %v2229_v18 = vpop.f32.mrb[6].mxu1 }
 0x2bd   :  { %v432_v19 = vadd.f32 %v2229_v18, %v2024_v17  ;;  %v426_v20 = vpop.f32.mrb[7].mxu1 }
 0x2be   :  { %v427_v21 = vadd.f32 %v2024_v17, %v426_v20 }
 0x2bf   :  { %2564 = vtanh.f32 %v432_v19 }
 0x2c0   :  { %2566 = vtanh.f32 %v427_v21  ;;  %v2232_v24 = vpop.f32.mrb[8].mxu1 }
 0x2c1   :  { %v442_v25 = vadd.f32 %v2232_v24, %v2024_v17  ;;  %v436_v26 = vpop.f32.mrb[9].mxu1 }
 0x2c2   :  { %v437_v27 = vadd.f32 %v2024_v17, %v436_v26 }
 0x2c3   :  { %2568 = vtanh.f32 %v442_v25 }
 0x2c4   :  { %2570 = vtanh.f32 %v437_v27  ;;  %v2235_v28 = vpop.f32.mrb[10].mxu1 }
 0x2c5   :  { %v452_v29 = vadd.f32 %v2235_v28, %v2024_v17  ;;  %v446_v30 = vpop.f32.mrb[11].mxu1 }
 0x2c6   :  { %v447_v31 = vadd.f32 %v2024_v17, %v446_v30 }
 0x2c7   :  { %2572 = vtanh.f32 %v452_v29 }
 0x2c8   :  { %2574 = vtanh.f32 %v447_v31 }
 0x2c9   :  { %v2565_v22 = vpop.eup %2564 }
 0x2ca   :  { %v2567_v23 = vpop.eup %2566  ;;  %463 = vst.msk [vmem:[%s3143_s15 + $0x8] sm:$0xff] %vm461_vm5, %v2565_v22 }
 0x2cb   :  { %462 = vst.msk [vmem:[%s3143_s15] sm:$0xff] %vm461_vm5, %v2567_v23  ;;  %2244 = vmatprep.mubr.msk.f32.mxu1 %vm461_vm5, %v2567_v23 }
 0x2cc   :  { %2245 = vmatmul.mubr.msk.f32.vlgmr.msra.gmra.mrb[12].mxu1 %vm461_vm5, %v2565_v22 }
 0x2cd   :  { %2457 = vmatpush3.bf16.msra.mxu1 %v2840_v8  ;;  %v2569_v32 = vpop.eup %2568 }
 0x2ce   :  { %2458 = vmatprep.subr.bf16.mxu1 %v2648_v11  ;;  %v2571_v33 = vpop.eup %2570  ;;  %465 = vst.msk [vmem:[%s3143_s15 + $0x18] sm:$0xff] %vm461_vm5, %v2569_v32 }
 0x2cf   :  { %464 = vst.msk [vmem:[%s3143_s15 + $0x10] sm:$0xff] %vm461_vm5, %v2571_v33  ;;  %2247 = vmatprep.mubr.msk.f32.mxu1 %vm461_vm5, %v2571_v33 }
 0x2d0   :  { %2248 = vmatmul.mubr.msk.f32.gmra.mrb[14].mxu1 %vm461_vm5, %v2569_v32 }
 0x2d1   :  { %2460 = vmatpush3.bf16.msra.mxu1 %v2857_v15  ;;  %v2573_v34 = vpop.eup %2572 }
 0x2d2   :  { %2467 = vmatprep.subr.bf16.mxu1 %v2648_v11  ;;  %v2575_v36 = vpop.eup %2574  ;;  %467 = vst.msk [vmem:[%s3143_s15 + $0x28] sm:$0xff] %vm461_vm5, %v2573_v34 }
 0x2d3   :  { %466 = vst.msk [vmem:[%s3143_s15 + $0x20] sm:$0xff] %vm461_vm5, %v2575_v36  ;;  %2250 = vmatprep.mubr.msk.f32.mxu1 %vm461_vm5, %v2575_v36  ;;  %s2651_s15 = smov 64  }
 0x2d4   :  { %2251 = vmatmul.mubr.msk.f32.gmra.mrb[16].mxu1 %vm461_vm5, %v2573_v34 }
 0x2d5   :  { %2272 = vmatprep.mubr.msk.f32.mxu1 %vm2649_vm4, %v2650_v16 }
 0x39f   :  { %v2246_v39 = vpop.f32.mrb[12].mxu1 }
 0x3a0   :  { %v567_v40 = vpop.f32.mrb[13].mxu1  ;;  %v573_v61 = vadd.f32 %v2246_v39, %v2913_v38 }
 0x3a1   :  { %v568_v41 = vadd.f32 %v2913_v38, %v567_v40 }
 0x3a3   :  { %v669_v42 = vadd.f32 %v665_v35, %v568_v41  ;;  %v2917_v44 = vpop.f32.mrb[14].mxu1 }
 0x3a4   :  { %v577_v45 = vpop.f32.mrb[15].mxu1  ;;  %v583_v37 = vadd.f32 %v2917_v44, %v2913_v38  ;;  %v1208_v44 = vld [vmem:[%s3145_s10] sm:$0xff] }
 0x3a5   :  { %2576 = vtanh.f32 %v669_v42  ;;  %v670_v48 = vmul.f32 0.5, %v669_v42  ;;  %v578_v19 = vadd.f32 %v2913_v38, %v577_v45 }
 0x3a7   :  { %v2919_v46 = vpop.f32.mrb[16].mxu1  ;;  %2578 = vtanh.f32 %v670_v48 }
 0x3a8   :  { %v2921_v47 = vpop.f32.mrb[17].mxu1 }
 0x3af   :  { %v2577_v43 = vpop.eup %2576 }
 0x3b0   :  { %677 = vrot.lane.b32.xlu0 %v2577_v43, %s2651_s15 }
 0x3b1   :  { %v2579_v49 = vpop.eup %2578 }
 0x3b2   :  { %v672_v50 = vmul.f32 0.5, %v2579_v49 }
 0x3b4   :  { %v673_v51 = vadd.f32 0.5, %v672_v50 }
 0x3b6   :  { %v675_v54 = vmul.f32 0.0, %v673_v51 }
 0x422   :  { %v678_v52 = vpop.permute.xlu0 %677 }
 0x423   :  { %v680_v53 = vmul.f32 %v678_v52, %v673_v51 }
 0x425   :  { %682 = vrot.lane.b32.xlu0 %v680_v53, %s2652_s9  ;;  %v1209_v53 = vld [vmem:[%s3145_s10 + $0x8] sm:$0xff] }
 0x497   :  { %v683_v55 = vpop.permute.xlu0 %682 }
 0x498   :  { %v685_v56 = vadd.f32 %v683_v55, %v675_v54  ;;  %v2485_v54 = vpack.c.bf16 %v1209_v53, %v1208_v44 }
 0x49a   :  { %2580 = vtanh.f32 %v685_v56 }
 0x4a4   :  { %v2581_v57 = vpop.eup %2580 }
 0x4a5   :  { %688 = vrot.lane.b32.xlu1 %v2581_v57, %s2651_s15 }
 0x517   :  { %v689_v58 = vpop.permute.xlu1 %688 }
 0x518   :  { %v691_v59 = vmul.f32 %v689_v58, %v673_v51  ;;  %v1210_v58 = vld [vmem:[%s3145_s10 + $0x10] sm:$0xff] }
 0x51a   :  { %693 = vrot.lane.b32.xlu1 %v691_v59, %s2652_s9  ;;  %v1211_v59 = vld [vmem:[%s3145_s10 + $0x18] sm:$0xff] }
 0x58c   :  { %v694_v60 = vpop.permute.xlu1 %693 }
 0x58d   :  { %696 = vst.msk [vmem:[#allocation2] sm:$0xff] %vm461_vm5, %v694_v60  ;;  %2273 = vmatmul.mubr.msk.f32.vlgmr.msra.gmra.mrb[18].mxu1 %vm461_vm5, %v694_v60  ;;  %v2489_v60 = vpack.c.bf16 %v1211_v59, %v1210_v58 }
 0x58e   :  { %2469 = vmatpush3.bf16.msra.mxu1 %v2840_v8  ;;  %2294 = vmatprep.mubr.msk.f32.mxu1 %vm2649_vm4, %v2650_v16 }
 0x58f   :  { %2470 = vmatprep.subr.bf16.mxu1 %v2648_v11 }
 0x592   :  { %2472 = vmatpush3.bf16.msra.mxu1 %v2857_v15 }
 0x593   :  { %2479 = vmatprep.subr.bf16.mxu1 %v2648_v11 }
 0x660   :  { %v765_v62 = vpop.f32.mrb[18].mxu1 }
 0x661   :  { %v769_v63 = vadd.f32 %v765_v62, %v573_v61  ;;  %v2274_v0 = vpop.f32.mrb[19].mxu1  ;;  %v1197_v62 = vld [vmem:[#allocation2] sm:$0xff] }
 0x663   :  { %2582 = vtanh.f32 %v769_v63  ;;  %v770_v2 = vmul.f32 0.5, %v769_v63 }
 0x665   :  { %2584 = vtanh.f32 %v770_v2  ;;  %v588_v2 = vadd.f32 %v2913_v38, %v2921_v47 }
 0x66d   :  { %v2583_v1 = vpop.eup %2582 }
 0x66e   :  { %777 = vrot.lane.b32.xlu0 %v2583_v1, %s2651_s15 }
 0x66f   :  { %v2585_v3 = vpop.eup %2584 }
 0x670   :  { %v772_v4 = vmul.f32 0.5, %v2585_v3 }
 0x672   :  { %v773_v5 = vadd.f32 0.5, %v772_v4 }
 0x674   :  { %v775_v9 = vmul.f32 %v773_v5, %v685_v56 }
 0x6e0   :  { %v778_v6 = vpop.permute.xlu0 %777 }
 0x6e1   :  { %v780_v7 = vmul.f32 %v778_v6, %v773_v5 }
 0x6e3   :  { %782 = vrot.lane.b32.xlu1 %v780_v7, %s2652_s9 }
 0x755   :  { %v783_v10 = vpop.permute.xlu1 %782 }
 0x756   :  { %v785_v12 = vadd.f32 %v783_v10, %v775_v9 }
 0x758   :  { %2586 = vtanh.f32 %v785_v12 }
 0x762   :  { %v2587_v13 = vpop.eup %2586 }
 0x763   :  { %788 = vrot.lane.b32.xlu0 %v2587_v13, %s2651_s15 }
 0x7d5   :  { %v789_v14 = vpop.permute.xlu0 %788 }
 0x7d6   :  { %v791_v17 = vmul.f32 %v789_v14, %v773_v5 }
 0x7d8   :  { %793 = vrot.lane.b32.xlu1 %v791_v17, %s2652_s9 }
 0x84a   :  { %v794_v18 = vpop.permute.xlu1 %793 }
 0x84b   :  { %796 = vst.msk [vmem:[#allocation2 + $0x8] sm:$0xff] %vm461_vm5, %v794_v18  ;;  %2284 = vmatmul.mubr.msk.f32.vlgmr.msra.gmra.mrb[8].mxu0 %vm461_vm5, %v794_v18 }
 0x84c   :  { %2475 = vmatpush3.bf16.msra.mxu0 %v2840_v8  ;;  %2305 = vmatprep.mubr.msk.f32.mxu0 %vm2649_vm4, %v2650_v16 }
 0x84d   :  { %2476 = vmatprep.subr.bf16.mxu0 %v2648_v11 }
 0x850   :  { %2478 = vmatpush3.bf16.msra.mxu0 %v2857_v15 }
 0x851   :  { %2486 = vmatprep.subr.bf16.mxu0 %v2485_v54 }
 0x852   :  { %v1198_v63 = vld [vmem:[#allocation2 + $0x8] sm:$0xff] }
 0x91e   :  { %v865_v20 = vpop.f32.mrb[8].mxu0 }
 0x91f   :  { %v869_v21 = vadd.f32 %v865_v20, %v578_v19  ;;  %v2285_v22 = vpop.f32.mrb[9].mxu0 }
 0x921   :  { %2588 = vtanh.f32 %v869_v21  ;;  %v870_v24 = vmul.f32 0.5, %v869_v21 }
 0x923   :  { %2590 = vtanh.f32 %v870_v24  ;;  %v1203_v24 = vld [vmem:[%s3146_s11] sm:$0xff] }
 0x92b   :  { %v2589_v23 = vpop.eup %2588 }
 0x92c   :  { %877 = vrot.lane.b32.xlu0 %v2589_v23, %s2651_s15 }
 0x92d   :  { %v2591_v25 = vpop.eup %2590 }
 0x92e   :  { %v872_v26 = vmul.f32 0.5, %v2591_v25  ;;  %v1204_v25 = vld [vmem:[%s3146_s11 + $0x8] sm:$0xff] }
 0x930   :  { %v873_v27 = vadd.f32 0.5, %v872_v26  ;;  %v3004_v26 = vpack.c.bf16 %v1204_v25, %v1203_v24 }
 0x932   :  { %v875_v30 = vmul.f32 %v873_v27, %v785_v12 }
 0x99e   :  { %v878_v28 = vpop.permute.xlu0 %877 }
 0x99f   :  { %v880_v29 = vmul.f32 %v878_v28, %v873_v27  ;;  %v1206_v28 = vld [vmem:[%s3146_s11 + $0x18] sm:$0xff] }
 0x9a1   :  { %882 = vrot.lane.b32.xlu1 %v880_v29, %s2652_s9 }
 0xa13   :  { %v883_v31 = vpop.permute.xlu1 %882 }
 0xa14   :  { %v885_v32 = vadd.f32 %v883_v31, %v875_v30 }
 0xa16   :  { %2592 = vtanh.f32 %v885_v32 }
 0xa20   :  { %v2593_v33 = vpop.eup %2592 }
 0xa21   :  { %888 = vrot.lane.b32.xlu0 %v2593_v33, %s2651_s15 }
 0xa93   :  { %v889_v34 = vpop.permute.xlu0 %888 }
 0xa94   :  { %v891_v35 = vmul.f32 %v889_v34, %v873_v27  ;;  %v1205_v27 = vld [vmem:[%s3146_s11 + $0x10] sm:$0xff]  ;;  %v593_v34 = vadd.f32 %v2919_v46, %v2913_v38 }
 0xa95   :  { %v3014_v29 = vpack.c.bf16 %v1206_v28, %v1205_v27 }
 0xa96   :  { %893 = vrot.lane.b32.xlu1 %v891_v35, %s2652_s9 }
 0xb08   :  { %v894_v36 = vpop.permute.xlu1 %893 }
 0xb09   :  { %896 = vst.msk [vmem:[#allocation2 + $0x10] sm:$0xff] %vm461_vm5, %v894_v36  ;;  %2295 = vmatmul.mubr.msk.f32.vlgmr.msra.gmra.mrb[20].mxu1 %vm461_vm5, %v894_v36 }
 0xb0a   :  { %2481 = vmatpush3.bf16.msra.mxu1 %v2840_v8  ;;  %2316 = vmatprep.mubr.msk.f32.mxu1 %vm2649_vm4, %v2650_v16 }
 0xb0b   :  { %2482 = vmatprep.subr.bf16.mxu1 %v2648_v11 }
 0xb0e   :  { %2484 = vmatpush3.bf16.msra.mxu1 %v2857_v15 }
 0xb0f   :  { %2493 = vmatprep.subr.bf16.mxu1 %v2648_v11 }
 0xb10   :  { %v1199_v0 = vld [vmem:[#allocation2 + $0x10] sm:$0xff] }
 0xbdc   :  { %v965_v39 = vpop.f32.mrb[20].mxu1 }
 0xbdd   :  { %v969_v40 = vadd.f32 %v965_v39, %v583_v37  ;;  %v2296_v41 = vpop.f32.mrb[21].mxu1  ;;  %v3040_v39 = vld [vmem:[%s3147_s12] ss:$0 sm:$0xff] }
 0xbdf   :  { %2594 = vtanh.f32 %v969_v40  ;;  %v970_v8 = vmul.f32 0.5, %v969_v40 }
 0xbe1   :  { %2596 = vtanh.f32 %v970_v8 }
 0xbe9   :  { %v2595_v42 = vpop.eup %2594 }
 0xbea   :  { %977 = vrot.lane.b32.xlu0 %v2595_v42, %s2651_s15 }
 0xbeb   :  { %v2597_v43 = vpop.eup %2596 }
 0xbec   :  { %v972_v45 = vmul.f32 0.5, %v2597_v43 }
 0xbee   :  { %v973_v48 = vadd.f32 0.5, %v972_v45 }
 0xbf0   :  { %v975_v15 = vmul.f32 %v973_v48, %v885_v32 }
 0xc5c   :  { %v978_v49 = vpop.permute.xlu0 %977 }
 0xc5d   :  { %v980_v50 = vmul.f32 %v978_v49, %v973_v48 }
 0xc5f   :  { %982 = vrot.lane.b32.xlu1 %v980_v50, %s2652_s9 }
 0xcd1   :  { %v983_v51 = vpop.permute.xlu1 %982 }
 0xcd2   :  { %v985_v52 = vadd.f32 %v983_v51, %v975_v15 }
 0xcd4   :  { %2598 = vtanh.f32 %v985_v52 }
 0xcde   :  { %v2599_v55 = vpop.eup %2598 }
 0xcdf   :  { %988 = vrot.lane.b32.xlu0 %v2599_v55, %s2651_s15 }
 0xd51   :  { %v989_v56 = vpop.permute.xlu0 %988 }
 0xd52   :  { %v991_v57 = vmul.f32 %v989_v56, %v973_v48 }
 0xd54   :  { %993 = vrot.lane.b32.xlu1 %v991_v57, %s2652_s9 }
 0xdc6   :  { %v994_v61 = vpop.permute.xlu1 %993 }
 0xdc7   :  { %996 = vst.msk [vmem:[#allocation2 + $0x18] sm:$0xff] %vm461_vm5, %v994_v61  ;;  %2306 = vmatmul.mubr.msk.f32.vlgmr.msra.gmra.mrb[10].mxu0 %vm461_vm5, %v994_v61 }
 0xdc8   :  { %2488 = vmatpush3.bf16.msra.mxu0 %v2485_v54  ;;  %2327 = vmatprep.mubr.msk.f32.mxu0 %vm461_vm5, %v1197_v62 }
 0xdc9   :  { %2490 = vmatprep.subr.bf16.mxu0 %v2489_v60 }
 0xdcc   :  { %2492 = vmatpush3.bf16.msra.mxu0 %v2489_v60 }
 0xdcd   :  { %2499 = vmatprep.subr.bf16.mxu0 %v2648_v11 }
 0xdce   :  { %v1200_v1 = vld [vmem:[#allocation2 + $0x18] sm:$0xff] }
 0xdcf   :  { %2328 = vmatmul.mubr.msk.f32.vlgmr.msra.gmra.mrb[12].mxu0 %vm461_vm5, %v1198_v63 }
 0xdd0   :  { %2330 = vmatprep.mubr.msk.f32.mxu0 %vm461_vm5, %v1199_v0  ;;  %2501 = vmatpush3.bf16.msra.mxu0 %v3004_v26 }
 0xdd1   :  { %2502 = vmatprep.subr.bf16.mxu0 %v2648_v11 }
 0xdd3   :  { %2331 = vmatmul.mubr.msk.f32.gmra.mrb[14].mxu0 %vm461_vm5, %v1200_v1 }
 0xdd4   :  { %2504 = vmatpush3.bf16.msra.mxu0 %v3014_v29 }
 0xdd5   :  { %2511 = vmatprep.subr.bf16.mxu0 %v2648_v11 }
 0xe9a   :  { %v1065_v3 = vpop.f32.mrb[10].mxu0 }
 0xe9b   :  { %v1069_v4 = vadd.f32 %v1065_v3, %v588_v2  ;;  %v2307_v5 = vpop.f32.mrb[11].mxu0 }
 0xe9d   :  { %2600 = vtanh.f32 %v1069_v4  ;;  %v1070_v13 = vmul.f32 0.5, %v1069_v4 }
 0xe9f   :  { %2602 = vtanh.f32 %v1070_v13 }
 0xea2   :  { %v2986_v6 = vpop.f32.mrb[12].mxu0 }
 0xea3   :  { %v1302_v7 = vpop.f32.mrb[13].mxu0 }
 0xea4   :  { %v1303_v40 = vadd.f32 %v3040_v39, %v1302_v7 }
 0xea6   :  { %v2988_v9 = vpop.f32.mrb[14].mxu0 }
 0xea7   :  { %v2601_v10 = vpop.eup %2600  ;;  %v2990_v12 = vpop.f32.mrb[15].mxu0 }
 0xea8   :  { %1077 = vrot.lane.b32.xlu0 %v2601_v10, %s2651_s15 }
 0xea9   :  { %v2603_v14 = vpop.eup %2602 }
 0xeaa   :  { %v1072_v17 = vmul.f32 0.5, %v2603_v14  ;;  %v1308_v14 = vadd.f32 %v2986_v6, %v3040_v39 }
 0xeac   :  { %v1073_v18 = vadd.f32 0.5, %v1072_v17 }
 0xeae   :  { %v1075_v20 = vmul.f32 %v1073_v18, %v985_v52 }
 0xf1a   :  { %v1078_v47 = vpop.permute.xlu0 %1077 }
 0xf1b   :  { %v1080_v19 = vmul.f32 %v1078_v47, %v1073_v18 }
 0xf1d   :  { %1082 = vrot.lane.b32.xlu1 %v1080_v19, %s2652_s9 }
 0xf8f   :  { %v1083_v21 = vpop.permute.xlu1 %1082 }
 0xf90   :  { %v2994_v22 = vadd.f32 %v1083_v21, %v1075_v20 }
 0xf92   :  { %2604 = vtanh.f32 %v2994_v22 }
 0xf9c   :  { %v2605_v23 = vpop.eup %2604 }
 0xf9d   :  { %1088 = vrot.lane.b32.xlu0 %v2605_v23, %s2651_s15 }
0x100f   :  { %v1089_v30 = vpop.permute.xlu0 %1088 }
0x1010   :  { %v1091_v31 = vmul.f32 %v1089_v30, %v1073_v18 }
0x1012   :  { %1093 = vrot.lane.b32.xlu1 %v1091_v31, %s2652_s9 }
0x1084   :  { %v1094_v32 = vpop.permute.xlu1 %1093 }
0x1085   :  { %1096 = vst.msk [vmem:[#allocation2 + $0x20] sm:$0xff] %vm461_vm5, %v1094_v32  ;;  %2317 = vmatmul.mubr.msk.f32.vlgmr.msra.gmra.mrb[22].mxu1 %vm461_vm5, %v1094_v32 }
0x1086   :  { %2495 = vmatpush3.bf16.msra.mxu1 %v3004_v26  ;;  %2344 = vmatprep.mubr.msk.f32.mxu1 %vm2649_vm4, %v2650_v16 }
0x1087   :  { %2496 = vmatprep.subr.bf16.mxu1 %v2648_v11 }
0x108a   :  { %2498 = vmatpush3.bf16.msra.mxu1 %v3014_v29 }
0x108b   :  { %2505 = vmatprep.subr.bf16.mxu1 %v2648_v11 }
0x108c   :  { %v1201_v33 = vld [vmem:[#allocation2 + $0x20] sm:$0xff] }
0x108d   :  { %2345 = vmatmul.mubr.f32.vlgmr.msra.gmra.mrb[24].mxu1 %v2650_v16  ;;  %2333 = vmatprep.mubr.msk.f32.mxu0 %vm461_vm5, %v1201_v33 }
0x108e   :  { %2507 = vmatpush3.bf16.msra.mxu1 %v3004_v26  ;;  %2366 = vmatprep.mubr.msk.f32.mxu1 %vm2649_vm4, %v2650_v16 }
0x108f   :  { %2508 = vmatprep.subr.bf16.mxu1 %v2648_v11 }
0x1092   :  { %2510 = vmatpush3.bf16.msra.mxu1 %v3014_v29 }
0x1093   :  { %2517 = vmatprep.subr.bf16.mxu1 %v2648_v11 }
0x1158   :  { %v1165_v35 = vpop.f32.mrb[22].mxu1 }
0x1159   :  { %v1169_v36 = vadd.f32 %v1165_v35, %v593_v34  ;;  %v2318_v37 = vpop.f32.mrb[23].mxu1  ;;  %v1313_v34 = vadd.f32 %v3040_v39, %v2990_v12 }
0x115b   :  { %2606 = vtanh.f32 %v1169_v36  ;;  %v1170_v38 = vmul.f32 0.5, %v1169_v36 }
0x1160   :  { %v1397_v41 = vpop.f32.mrb[24].mxu1 }
0x1161   :  { %v1401_v42 = vadd.f32 %v1397_v41, %v1303_v40  ;;  %v2346_v8 = vpop.f32.mrb[25].mxu1 }
0x1163   :  { %2608 = vtanh.f32 %v1401_v42  ;;  %v1402_v46 = vmul.f32 0.5, %v1401_v42 }
0x1164   :  { %2610 = vtanh.f32 %v1170_v38 }
0x1165   :  { %v2607_v43 = vpop.eup %2606  ;;  %2612 = vtanh.f32 %v1402_v46 }
0x1166   :  { %1177 = vrot.lane.b32.xlu0 %v2607_v43, %s2651_s15 }
0x116d   :  { %v2609_v45 = vpop.eup %2608 }
0x116e   :  { %1409 = vrot.lane.b32.xlu1 %v2609_v45, %s2651_s15  ;;  %v2611_v48 = vpop.eup %2610 }
0x116f   :  { %v1172_v49 = vmul.f32 0.5, %v2611_v48  ;;  %v2613_v15 = vpop.eup %2612 }
0x1170   :  { %v1404_v44 = vmul.f32 0.5, %v2613_v15 }
0x1171   :  { %v1173_v50 = vadd.f32 0.5, %v1172_v49 }
0x1172   :  { %v1405_v53 = vadd.f32 0.5, %v1404_v44 }
0x1173   :  { %v1175_v56 = vmul.f32 %v1173_v50, %v2994_v22 }
0x1174   :  { %v1407_v59 = vmul.f32 0.0, %v1405_v53 }
0x11d8   :  { %v1178_v51 = vpop.permute.xlu0 %1177 }
0x11d9   :  { %v1180_v52 = vmul.f32 %v1178_v51, %v1173_v50 }
0x11db   :  { %1182 = vrot.lane.b32.xlu0 %v1180_v52, %s2652_s9  ;;  %v1318_v52 = vadd.f32 %v2988_v9, %v3040_v39 }
0x11e0   :  { %v1410_v54 = vpop.permute.xlu1 %1409 }
0x11e1   :  { %v1412_v55 = vmul.f32 %v1410_v54, %v1405_v53 }
0x11e3   :  { %1414 = vrot.lane.b32.xlu1 %v1412_v55, %s2652_s9 }
0x124d   :  { %v1183_v57 = vpop.permute.xlu0 %1182 }
0x124e   :  { %v1185_v58 = vadd.f32 %v1183_v57, %v1175_v56 }
0x1250   :  { %2614 = vtanh.f32 %v1185_v58 }
0x1255   :  { %v1415_v60 = vpop.permute.xlu1 %1414 }
0x1256   :  { %v1417_v61 = vadd.f32 %v1415_v60, %v1407_v59 }
0x1258   :  { %2616 = vtanh.f32 %v1417_v61 }
0x125a   :  { %v2615_v62 = vpop.eup %2614 }
0x125b   :  { %1188 = vrot.lane.b32.xlu0 %v2615_v62, %s2651_s15 }
0x1262   :  { %v2617_v63 = vpop.eup %2616 }
0x1263   :  { %1420 = vrot.lane.b32.xlu1 %v2617_v63, %s2651_s15 }
0x12cd   :  { %v1189_v0 = vpop.permute.xlu0 %1188 }
0x12ce   :  { %v1191_v1 = vmul.f32 %v1189_v0, %v1173_v50 }
0x12d0   :  { %1193 = vrot.lane.b32.xlu0 %v1191_v1, %s2652_s9 }
0x12d5   :  { %v1421_v2 = vpop.permute.xlu1 %1420 }
0x12d6   :  { %v1423_v3 = vmul.f32 %v1421_v2, %v1405_v53 }
0x12d8   :  { %1425 = vrot.lane.b32.xlu1 %v1423_v3, %s2652_s9 }
0x1342   :  { %v1194_v4 = vpop.permute.xlu0 %1193 }
0x1343   :  { %1196 = vst.msk [vmem:[#allocation2 + $0x28] sm:$0xff] %vm461_vm5, %v1194_v4 }
0x134a   :  { %v1202_v5 = vld [vmem:[#allocation2 + $0x28] sm:$0xff]  ;;  %v1426_v7 = vpop.permute.xlu1 %1425 }
0x134b   :  { %2334 = vmatmul.mubr.msk.f32.gmra.mrb[16].mxu0 %vm461_vm5, %v1202_v5 }
0x134c   :  { %2355 = vmatprep.mubr.msk.f32.mxu0 %vm2649_vm4, %v2650_v16 }
0x134f   :  { %2356 = vmatmul.mubr.msk.f32.vlgmr.msra.gmra.mrb[18].mxu0 %vm461_vm5, %v1426_v7 }
0x1350   :  { %2513 = vmatpush3.bf16.msra.mxu0 %v3004_v26  ;;  %2377 = vmatprep.mubr.msk.f32.mxu0 %vm2649_vm4, %v2650_v16 }
0x1351   :  { %2514 = vmatprep.subr.bf16.mxu0 %v2648_v11 }
0x1354   :  { %2516 = vmatpush3.bf16.msra.mxu0 %v3014_v29 }
0x1355   :  { %2523 = vmatprep.subr.bf16.mxu0 %v2648_v11 }
0x141e   :  { %v3063_v10 = vpop.f32.mrb[16].mxu0 }
0x141f   :  { %v3065_v13 = vpop.f32.mrb[17].mxu0 }
0x1420   :  { %v1323_v2 = vadd.f32 %v3040_v39, %v3065_v13 }
0x1422   :  { %v1495_v17 = vpop.f32.mrb[18].mxu0 }
0x1423   :  { %v1499_v18 = vadd.f32 %v1495_v17, %v1308_v14  ;;  %v2357_v47 = vpop.f32.mrb[19].mxu0 }
0x1425   :  { %2618 = vtanh.f32 %v1499_v18  ;;  %v1500_v20 = vmul.f32 0.5, %v1499_v18 }
0x1427   :  { %2620 = vtanh.f32 %v1500_v20 }
0x142f   :  { %v2619_v19 = vpop.eup %2618 }
0x1430   :  { %1507 = vrot.lane.b32.xlu0 %v2619_v19, %s2651_s15 }
0x1431   :  { %v2621_v21 = vpop.eup %2620 }
0x1432   :  { %v1502_v22 = vmul.f32 0.5, %v2621_v21 }
0x1434   :  { %v1503_v23 = vadd.f32 0.5, %v1502_v22 }
0x1436   :  { %v1505_v27 = vmul.f32 %v1503_v23, %v1417_v61 }
0x14a2   :  { %v1508_v24 = vpop.permute.xlu0 %1507 }
0x14a3   :  { %v1510_v25 = vmul.f32 %v1508_v24, %v1503_v23 }
0x14a5   :  { %1512 = vrot.lane.b32.xlu1 %v1510_v25, %s2652_s9 }
0x1517   :  { %v1513_v28 = vpop.permute.xlu1 %1512 }
0x1518   :  { %v1515_v30 = vadd.f32 %v1513_v28, %v1505_v27  ;;  %v1328_v27 = vadd.f32 %v3063_v10, %v3040_v39  ;;  %v1914_v39 = vld [vmem:[%s3148_s13] sm:$0xff]  ;;  %v1915_v10 = vld [vmem:[%s3148_s13 + $0x8] sm:$0xff] }
0x151a   :  { %2622 = vtanh.f32 %v1515_v30 }
0x1524   :  { %v2623_v6 = vpop.eup %2622 }
0x1525   :  { %1518 = vrot.lane.b32.xlu0 %v2623_v6, %s2651_s15 }
0x1597   :  { %v1519_v31 = vpop.permute.xlu0 %1518 }
0x1598   :  { %v1521_v32 = vmul.f32 %v1519_v31, %v1503_v23 }
0x159a   :  { %1523 = vrot.lane.b32.xlu1 %v1521_v32, %s2652_s9 }
0x160c   :  { %v1524_v33 = vpop.permute.xlu1 %1523 }
0x160d   :  { %2367 = vmatmul.mubr.msk.f32.vlgmr.msra.gmra.mrb[26].mxu1 %vm461_vm5, %v1524_v33 }
0x160e   :  { %2519 = vmatpush3.bf16.msra.mxu1 %v3004_v26  ;;  %2388 = vmatprep.mubr.msk.f32.mxu1 %vm2649_vm4, %v2650_v16 }
0x160f   :  { %2520 = vmatprep.subr.bf16.mxu1 %v2648_v11 }
0x1612   :  { %2522 = vmatpush3.bf16.msra.mxu1 %v3014_v29 }
0x1613   :  { %2529 = vmatprep.subr.bf16.mxu1 %v2648_v11 }
0x16e0   :  { %v1593_v35 = vpop.f32.mrb[26].mxu1 }
0x16e1   :  { %v1597_v36 = vadd.f32 %v1593_v35, %v1313_v34  ;;  %v2368_v37 = vpop.f32.mrb[27].mxu1 }
0x16e3   :  { %2624 = vtanh.f32 %v1597_v36  ;;  %v1598_v41 = vmul.f32 0.5, %v1597_v36 }
0x16e5   :  { %2626 = vtanh.f32 %v1598_v41 }
0x16ed   :  { %v2625_v40 = vpop.eup %2624 }
0x16ee   :  { %1605 = vrot.lane.b32.xlu0 %v2625_v40, %s2651_s15 }
0x16ef   :  { %v2627_v42 = vpop.eup %2626 }
0x16f0   :  { %v1600_v8 = vmul.f32 0.5, %v2627_v42 }
0x16f2   :  { %v1601_v43 = vadd.f32 0.5, %v1600_v8  ;;  %v1916_v8 = vld [vmem:[%s3148_s13 + $0x10] sm:$0xff] }
0x16f4   :  { %v1603_v46 = vmul.f32 %v1601_v43, %v1515_v30 }
0x1760   :  { %v1606_v45 = vpop.permute.xlu0 %1605 }
0x1761   :  { %v1608_v38 = vmul.f32 %v1606_v45, %v1601_v43  ;;  %v1917_v45 = vld [vmem:[%s3148_s13 + $0x18] sm:$0xff] }
0x1763   :  { %1610 = vrot.lane.b32.xlu1 %v1608_v38, %s2652_s9  ;;  %v2533_v38 = vpack.c.bf16 %v1917_v45, %v1916_v8 }
0x17d5   :  { %v1611_v48 = vpop.permute.xlu1 %1610 }
0x17d6   :  { %v1613_v49 = vadd.f32 %v1611_v48, %v1603_v46  ;;  %v22_v48 = vstv %s3149_s14 }
0x17d7   :  { %23 = vst [vmem:[#allocation3] sm:$0x1] %v22_v48 }
0x17d8   :  { %2628 = vtanh.f32 %v1613_v49 }
0x17e2   :  { %v2629_v12 = vpop.eup %2628 }
0x17e3   :  { %1616 = vrot.lane.b32.xlu0 %v2629_v12, %s2651_s15 }
0x1855   :  { %v1617_v50 = vpop.permute.xlu0 %1616 }
0x1856   :  { %v1619_v15 = vmul.f32 %v1617_v50, %v1601_v43  ;;  %v2530_v43 = vpack.c.bf16 %v1915_v10, %v1914_v39 }
0x1858   :  { %1621 = vrot.lane.b32.xlu1 %v1619_v15, %s2652_s9  ;;  %v2056_v15 = vld [vmem:[#allocation3] ss:$0 sm:$0xff] }
0x18ca   :  { %v1622_v51 = vpop.permute.xlu1 %1621 }
0x18cb   :  { %2378 = vmatmul.mubr.msk.f32.vlgmr.msra.gmra.mrb[20].mxu0 %vm461_vm5, %v1622_v51 }
0x18cc   :  { %2525 = vmatpush3.bf16.msra.mxu0 %v3004_v26  ;;  %2399 = vmatprep.mubr.msk.f32.mxu0 %vm2649_vm4, %v2650_v16 }
0x18cd   :  { %2526 = vmatprep.subr.bf16.mxu0 %v2648_v11 }
0x18d0   :  { %2528 = vmatpush3.bf16.msra.mxu0 %v3014_v29 }
0x199e   :  { %v1691_v44 = vpop.f32.mrb[20].mxu0 }
0x199f   :  { %v1695_v53 = vadd.f32 %v1691_v44, %v1318_v52  ;;  %v2379_v54 = vpop.f32.mrb[21].mxu0 }
0x19a1   :  { %2630 = vtanh.f32 %v1695_v53  ;;  %v1696_v56 = vmul.f32 0.5, %v1695_v53 }
0x19a3   :  { %2632 = vtanh.f32 %v1696_v56 }
0x19ab   :  { %v2631_v55 = vpop.eup %2630 }
0x19ac   :  { %1703 = vrot.lane.b32.xlu0 %v2631_v55, %s2651_s15 }
0x19ad   :  { %v2633_v26 = vpop.eup %2632 }
0x19ae   :  { %v1698_v57 = vmul.f32 0.5, %v2633_v26 }
0x19b0   :  { %v1699_v58 = vadd.f32 0.5, %v1698_v57 }
0x19b2   :  { %v1701_v29 = vmul.f32 %v1699_v58, %v1613_v49 }
0x1a1e   :  { %v1704_v59 = vpop.permute.xlu0 %1703 }
0x1a1f   :  { %v1706_v60 = vmul.f32 %v1704_v59, %v1699_v58 }
0x1a21   :  { %1708 = vrot.lane.b32.xlu1 %v1706_v60, %s2652_s9 }
0x1a93   :  { %v1709_v61 = vpop.permute.xlu1 %1708 }
0x1a94   :  { %v1711_v62 = vadd.f32 %v1709_v61, %v1701_v29 }
0x1a96   :  { %2634 = vtanh.f32 %v1711_v62 }
0x1aa0   :  { %v2635_v9 = vpop.eup %2634 }
0x1aa1   :  { %1714 = vrot.lane.b32.xlu0 %v2635_v9, %s2651_s15 }
0x1b13   :  { %v1715_v63 = vpop.permute.xlu0 %1714 }
0x1b14   :  { %v1717_v0 = vmul.f32 %v1715_v63, %v1699_v58 }
0x1b16   :  { %1719 = vrot.lane.b32.xlu1 %v1717_v0, %s2652_s9 }
0x1b88   :  { %v1720_v1 = vpop.permute.xlu1 %1719 }
0x1b89   :  { %2389 = vmatmul.mubr.msk.f32.vlgmr.msra.gmra.mrb[28].mxu1 %vm461_vm5, %v1720_v1 }
0x1b8a   :  { %2410 = vmatprep.mubr.msk.f32.mxu1 %vm2649_vm4, %v2650_v16  ;;  %2531 = vmatpush3.bf16.msra.mxu1 %v2530_v43 }
0x1b8b   :  { %2532 = vmatprep.subr.bf16.mxu1 %v2648_v11 }
0x1b8e   :  { %2534 = vmatpush3.bf16.msra.mxu1 %v2533_v38 }
0x1c5c   :  { %v1789_v3 = vpop.f32.mrb[28].mxu1 }
0x1c5d   :  { %v1793_v4 = vadd.f32 %v1789_v3, %v1323_v2  ;;  %v2390_v5 = vpop.f32.mrb[29].mxu1 }
0x1c5f   :  { %2636 = vtanh.f32 %v1793_v4  ;;  %v1794_v14 = vmul.f32 0.5, %v1793_v4 }
0x1c61   :  { %2638 = vtanh.f32 %v1794_v14 }
0x1c69   :  { %v2637_v7 = vpop.eup %2636 }
0x1c6a   :  { %1801 = vrot.lane.b32.xlu0 %v2637_v7, %s2651_s15 }
0x1c6b   :  { %v2639_v17 = vpop.eup %2638 }
0x1c6c   :  { %v1796_v18 = vmul.f32 0.5, %v2639_v17 }
0x1c6e   :  { %v1797_v47 = vadd.f32 0.5, %v1796_v18 }
0x1c70   :  { %v1799_v16 = vmul.f32 %v1797_v47, %v1711_v62 }
0x1cdc   :  { %v1802_v19 = vpop.permute.xlu0 %1801 }
0x1cdd   :  { %v1804_v20 = vmul.f32 %v1802_v19, %v1797_v47 }
0x1cdf   :  { %1806 = vrot.lane.b32.xlu1 %v1804_v20, %s2652_s9 }
0x1d51   :  { %v1807_v21 = vpop.permute.xlu1 %1806 }
0x1d52   :  { %v1809_v22 = vadd.f32 %v1807_v21, %v1799_v16 }
0x1d54   :  { %2640 = vtanh.f32 %v1809_v22 }
0x1d5e   :  { %v2641_v13 = vpop.eup %2640 }
0x1d5f   :  { %1812 = vrot.lane.b32.xlu0 %v2641_v13, %s2651_s15 }
0x1dd1   :  { %v1813_v23 = vpop.permute.xlu0 %1812 }
0x1dd2   :  { %v1815_v24 = vmul.f32 %v1813_v23, %v1797_v47 }
0x1dd4   :  { %1817 = vrot.lane.b32.xlu1 %v1815_v24, %s2652_s9 }
0x1e46   :  { %v1818_v25 = vpop.permute.xlu1 %1817 }
0x1e47   :  { %2400 = vmatmul.mubr.msk.f32.vlgmr.msra.gmra.mrb[22].mxu0 %vm461_vm5, %v1818_v25 }
0x1f1a   :  { %v1887_v28 = vpop.f32.mrb[22].mxu0 }
0x1f1b   :  { %v1891_v30 = vadd.f32 %v1887_v28, %v1328_v27  ;;  %v2401_v6 = vpop.f32.mrb[23].mxu0 }
0x1f1d   :  { %2642 = vtanh.f32 %v1891_v30  ;;  %v1892_v32 = vmul.f32 0.5, %v1891_v30 }
0x1f1f   :  { %2644 = vtanh.f32 %v1892_v32 }
0x1f27   :  { %v2643_v31 = vpop.eup %2642 }
0x1f28   :  { %1899 = vrot.lane.b32.xlu0 %v2643_v31, %s2651_s15 }
0x1f29   :  { %v2645_v33 = vpop.eup %2644 }
0x1f2a   :  { %v1894_v34 = vmul.f32 0.5, %v2645_v33 }
0x1f2c   :  { %v1895_v35 = vadd.f32 0.5, %v1894_v34 }
0x1f2e   :  { %v1897_v40 = vmul.f32 %v1895_v35, %v1809_v22 }
0x1f9a   :  { %v1900_v36 = vpop.permute.xlu0 %1899 }
0x1f9b   :  { %v1902_v37 = vmul.f32 %v1900_v36, %v1895_v35 }
0x1f9d   :  { %1904 = vrot.lane.b32.xlu1 %v1902_v37, %s2652_s9 }
0x200f   :  { %v1905_v41 = vpop.permute.xlu1 %1904 }
0x2010   :  { %v1907_v42 = vadd.f32 %v1905_v41, %v1897_v40 }
0x2012   :  { %2646 = vtanh.f32 %v1907_v42 }
0x201c   :  { %v2647_v46 = vpop.eup %2646 }
0x201d   :  { %1910 = vrot.lane.b32.xlu0 %v2647_v46, %s2651_s15 }
0x208f   :  { %v1911_v49 = vpop.permute.xlu0 %1910 }
0x2090   :  { %v1913_v12 = vmul.f32 %v1911_v49, %v1895_v35 }
0x2092   :  { %1926 = vrot.lane.b32.xlu1 %v1913_v12, %s2652_s9 }
0x2104   :  { %v1927_v50 = vpop.permute.xlu1 %1926 }
0x2105   :  { %2411 = vmatmul.mubr.msk.f32.vlgmr.msra.gmra.mrb[30].mxu1 %vm461_vm5, %v1927_v50 }
0x21d8   :  { %v1996_v51 = vpop.f32.mrb[30].mxu1 }
0x21d9   :  { %v1997_v11 = vadd.f32 %v2056_v15, %v1996_v51  ;;  %v2412_v52 = vpop.f32.mrb[31].mxu1 }
0x21db   :  { %2001 = vst.msk [vmem:[%s3150_s16] sm:$0xff] %vm2000_vm6, %v1997_v11 }

</bundles_post_ra>
